<compile_context>
chip_gen: v7x
topology: tpu7x:2x2x1
jax: 0.10.0
libtpu: 0.0.40
codegen_flags: <defaults>
</compile_context>

<pallas_src>
import jax
import jax.numpy as jnp
from jax.experimental import pallas as pl
from jax.experimental.pallas import tpu as pltpu

DIM = 64
HEADS = 8
HEAD_DIM = DIM // HEADS
MLP_HIDDEN = int(DIM * 4.0)
EPS = 1e-5


def _layernorm(x, gamma, beta):
    mean = jnp.mean(x, axis=-1, keepdims=True)
    var = jnp.mean((x - mean) ** 2, axis=-1, keepdims=True)
    return (x - mean) * jax.lax.rsqrt(var + EPS) * gamma + beta


def _gelu_exact(x):
    # nn.GELU default (approximate='none') -> erf-based
    return 0.5 * x * (1.0 + jax.lax.erf(x * (1.0 / jnp.sqrt(2.0))))


def _make_kernel(bt, lq, lk):
    """Kernel processing bt batch items (flattened to (bt*lq, D) rows) per step."""
    nq = bt * lq
    scale = 1.0 / (HEAD_DIM ** 0.5)

    def kernel(src_ref, kv_ref, vecs_ref,
               wq_ref, wkv_ref, bkv_ref, wo_ref,
               w1_ref, bm1_ref, w2_ref,
               out_ref):
        x = src_ref[...]       # (bt*lq, D) f32
        xkv = kv_ref[...]      # (bt*lk, D) f32

        vecs = vecs_ref[...]   # (8, D) f32: rows = g1, be1, bq, bo, g2, be2, bm2, 0
        g1, be1 = vecs[0:1], vecs[1:2]
        bq, bo = vecs[2:3], vecs[3:4]
        g2, be2 = vecs[4:5], vecs[5:6]
        bm2 = vecs[6:7]

        # --- norm1 applied to both query and key/value streams ---
        xn = _layernorm(x, g1, be1)
        xkvn = _layernorm(xkv, g1, be1)

        # --- in-projections: Q separate, K|V fused; bf16 MXU operands, f32 acc ---
        q = jnp.dot(xn.astype(jnp.bfloat16), wq_ref[...],
                    preferred_element_type=jnp.float32) + bq
        kv = jnp.dot(xkvn.astype(jnp.bfloat16), wkv_ref[...],
                     preferred_element_type=jnp.float32) + bkv_ref[...]

        q16 = q.astype(jnp.bfloat16)
        k16 = kv[:, :DIM].astype(jnp.bfloat16)
        v16 = kv[:, DIM:].astype(jnp.bfloat16)

        # --- multi-head cross attention, batched over the bt tile items;
        #     per-head output folded directly into the output projection ---
        attn = None
        for h in range(HEADS):  # static unroll
            cs = slice(h * HEAD_DIM, (h + 1) * HEAD_DIM)
            qh = q16[:, cs].reshape(bt, lq, HEAD_DIM)
            kh = k16[:, cs].reshape(bt, lk, HEAD_DIM)
            vh = v16[:, cs].reshape(bt, lk, HEAD_DIM)

            s = jnp.einsum('bqd,bkd->bqk', qh, kh,
                           preferred_element_type=jnp.float32) * scale
            s = s - jnp.max(s, axis=-1, keepdims=True)
            p = jnp.exp(s)
            p = p * pl.reciprocal(jnp.sum(p, axis=-1, keepdims=True),
                                  approx=True)
            oh = jnp.einsum('bqk,bkd->bqd', p.astype(jnp.bfloat16), vh,
                            preferred_element_type=jnp.float32)
            part = jnp.dot(oh.reshape(nq, HEAD_DIM).astype(jnp.bfloat16),
                           wo_ref[cs, :],   # static (HEAD_DIM, D) ref window
                           preferred_element_type=jnp.float32)
            attn = part if attn is None else attn + part
        attn = attn + bo

        # --- first residual ---
        src1 = x + attn

        # --- norm2 + MLP ---
        xn2 = _layernorm(src1, g2, be2)
        h1 = jnp.dot(xn2.astype(jnp.bfloat16), w1_ref[...],
                     preferred_element_type=jnp.float32) + bm1_ref[...]
        h1 = _gelu_exact(h1)
        mlp = jnp.dot(h1.astype(jnp.bfloat16), w2_ref[...],
                      preferred_element_type=jnp.float32) + bm2

        # --- second residual (sublane-dense 2-D store) ---
        out_ref[...] = (src1 + mlp).astype(out_ref.dtype)

    return kernel


def _pack_params(params):
    """Pack the 16 torch-layout arrays into 8 kernel inputs (weights as bf16)."""
    (g1, be1, wq, wk, wv, bq, bk, bv, wo, bo, g2, be2, w1, bm1, w2, bm2) = params
    bf16 = jnp.bfloat16
    vecs = jnp.concatenate(
        [g1, be1, bq, bo, g2, be2, bm2, jnp.zeros_like(g1)],
        axis=0).astype(jnp.float32)                       # (8, D)
    wkv = jnp.concatenate([wk, wv], axis=1).astype(bf16)  # (D, 2D)
    bkv = jnp.concatenate([bk, bv], axis=1).astype(jnp.float32)  # (1, 2D)
    return (vecs, wq.astype(bf16), wkv, bkv, wo.astype(bf16),
            w1.astype(bf16), bm1.astype(jnp.float32), w2.astype(bf16))


def _choose_bt(B, Lq, Lk, target_rows=1024, max_rows=4096):
    """Pick the per-step batch tile.

    Constraints: bt divides B (no wrapper-side zero-pad concat -> no extra HBM
    traffic); if there is more than one grid step, both (bt*Lq, D) and
    (bt*Lk, D) blocks must keep the sublane tiling constraint (rows % 8 == 0).
    Preferences: ~target_rows query rows per step (amortize the ~0.35us per-step
    pipeline overhead and fill the 256-row MXU), and an even step count when
    steps > 1 (the "parallel" grid axis is sharded over v7x's 2 TensorCores).
    """
    best_bt, best_score = B, None
    for bt in range(1, B + 1):
        if B % bt:
            continue
        steps = B // bt
        rows = bt * Lq
        if steps > 1 and (rows % 8 or (bt * Lk) % 8):
            continue
        score = -abs(rows - target_rows)
        if steps > 1 and steps % 2:
            score -= target_rows            # odd step count idles one v7x core
        if rows > max_rows:
            score -= 4 * (rows - max_rows)  # keep blocks well inside VMEM
        if best_score is None or score > best_score:
            best_bt, best_score = bt, score
    return best_bt


def cross_block(src, src_kv, params, target_rows=1024):
    """src: (B, Lq, D), src_kv: (B, Lk, D). params: tuple of 16 arrays."""
    B, Lq, D = src.shape
    _, Lk, _ = src_kv.shape
    assert D == DIM

    bt = _choose_bt(B, Lq, Lk, target_rows=target_rows)
    steps = B // bt

    # Flatten to sublane-dense 2-D slabs (contiguous rows per batch tile).
    src2 = src.reshape(B * Lq, D).astype(jnp.float32)
    kv2 = src_kv.reshape(B * Lk, D).astype(jnp.float32)
    packed = _pack_params(params)

    data_specs = [
        pl.BlockSpec((bt * Lq, D), lambda i: (i, 0)),
        pl.BlockSpec((bt * Lk, D), lambda i: (i, 0)),
    ]
    param_specs = [pl.BlockSpec(p.shape, lambda i: (0, 0)) for p in packed]

    out2 = pl.pallas_call(
        _make_kernel(bt, Lq, Lk),
        out_shape=jax.ShapeDtypeStruct((B * Lq, D), jnp.float32),
        grid_spec=pltpu.PrefetchScalarGridSpec(
            num_scalar_prefetch=0,
            grid=(steps,),
            in_specs=data_specs + param_specs,
            out_specs=pl.BlockSpec((bt * Lq, D), lambda i: (i, 0)),
        ),
        compiler_params=pltpu.CompilerParams(
            dimension_semantics=("parallel",)),
    )(src2, kv2, *packed)

    return out2.reshape(B, Lq, D)


def reference(src, src_kv, params):
    (g1, be1, wq, wk, wv, bq, bk, bv, wo, bo, g2, be2, w1, bm1, w2, bm2) = params

    def ln(x, g, b):
        m = x.mean(-1, keepdims=True)
        v = ((x - m) ** 2).mean(-1, keepdims=True)
        return (x - m) / jnp.sqrt(v + EPS) * g + b

    B, Lq, D = src.shape
    Lk = src_kv.shape[1]
    xn = ln(src, g1[0], be1[0])
    xkvn = ln(src_kv, g1[0], be1[0])
    q = xn @ wq + bq[0]
    k = xkvn @ wk + bk[0]
    v = xkvn @ wv + bv[0]
    qh = q.reshape(B, Lq, HEADS, HEAD_DIM).transpose(0, 2, 1, 3)
    kh = k.reshape(B, Lk, HEADS, HEAD_DIM).transpose(0, 2, 1, 3)
    vh = v.reshape(B, Lk, HEADS, HEAD_DIM).transpose(0, 2, 1, 3)
    s = jnp.einsum('bhqd,bhkd->bhqk', qh, kh) / jnp.sqrt(float(HEAD_DIM))
    p = jax.nn.softmax(s, axis=-1)
    o = jnp.einsum('bhqk,bhkd->bhqd', p, vh).transpose(0, 2, 1, 3).reshape(B, Lq, D)
    attn = o @ wo + bo[0]
    src1 = src + attn
    xn2 = ln(src1, g2[0], be2[0])
    h1 = xn2 @ w1 + bm1[0]
    h1 = 0.5 * h1 * (1.0 + jax.lax.erf(h1 / jnp.sqrt(2.0)))
    return src1 + (h1 @ w2 + bm2[0])


def make_params(key):
    ks = jax.random.split(key, 12)
    s = 0.05
    g1 = jnp.ones((1, DIM), jnp.float32)
    be1 = jnp.zeros((1, DIM), jnp.float32)
    wq = s * jax.random.normal(ks[0], (DIM, DIM), jnp.float32)
    wk = s * jax.random.normal(ks[1], (DIM, DIM), jnp.float32)
    wv = s * jax.random.normal(ks[2], (DIM, DIM), jnp.float32)
    bq = s * jax.random.normal(ks[3], (1, DIM), jnp.float32)
    bk = s * jax.random.normal(ks[4], (1, DIM), jnp.float32)
    bv = s * jax.random.normal(ks[5], (1, DIM), jnp.float32)
    wo = s * jax.random.normal(ks[6], (DIM, DIM), jnp.float32)
    bo = s * jax.random.normal(ks[7], (1, DIM), jnp.float32)
    g2 = jnp.ones((1, DIM), jnp.float32)
    be2 = jnp.zeros((1, DIM), jnp.float32)
    w1 = s * jax.random.normal(ks[8], (DIM, MLP_HIDDEN), jnp.float32)
    bm1 = s * jax.random.normal(ks[9], (1, MLP_HIDDEN), jnp.float32)
    w2 = s * jax.random.normal(ks[10], (MLP_HIDDEN, DIM), jnp.float32)
    bm2 = s * jax.random.normal(ks[11], (1, DIM), jnp.float32)
    return (g1, be1, wq, wk, wv, bq, bk, bv, wo, bo, g2, be2, w1, bm1, w2, bm2)


if __name__ == "__main__":
    key = jax.random.PRNGKey(0)
    k_src, k_kv, k_par = jax.random.split(key, 3)

    B, Lq, Lk = 2, 8, 8
    src = jax.random.normal(k_src, (B, Lq, DIM), jnp.float32)
    src_kv = jax.random.normal(k_kv, (B, Lk, DIM), jnp.float32)
    params = make_params(k_par)

    out = cross_block(src, src_kv, params)
    out = jax.block_until_ready(out)

    ref = reference(src, src_kv, params)
    assert out.shape == (B, Lq, DIM)
    err = float(jnp.max(jnp.abs(out - ref)))
    # tolerance accounts for bf16 MXU operands (f32 accumulation) and the
    # approximate EUP reciprocal in the softmax vs the f32 reference
    assert err < 1e-2, f"max err {err}"

    print("KERNEL_OK")
</pallas_src>

<mosaic_0001>
module attributes {stable_mosaic.version = 11 : i64} {
  func.func @kernel(%arg0: i32, %arg1: memref<16x64xf32, #tpu.memory_space<vmem>>, %arg2: memref<16x64xf32, #tpu.memory_space<vmem>>, %arg3: memref<8x64xf32, #tpu.memory_space<vmem>>, %arg4: memref<64x64xbf16, #tpu.memory_space<vmem>>, %arg5: memref<64x128xbf16, #tpu.memory_space<vmem>>, %arg6: memref<1x128xf32, #tpu.memory_space<vmem>>, %arg7: memref<64x64xbf16, #tpu.memory_space<vmem>>, %arg8: memref<64x256xbf16, #tpu.memory_space<vmem>>, %arg9: memref<1x256xf32, #tpu.memory_space<vmem>>, %arg10: memref<256x64xbf16, #tpu.memory_space<vmem>>, %arg11: memref<16x64xf32, #tpu.memory_space<vmem>>) attributes {dimension_semantics = [#tpu.dimension_semantics<parallel>], iteration_bounds = array<i64: 1>, scalar_prefetch = 0 : i64, scratch_operands = 0 : i64, tpu.core_type = #tpu.core_type<tc>, window_params = [{transform_indices = @transform_0, window_bounds = array<i64: 16, 64>}, {transform_indices = @transform_1, window_bounds = array<i64: 16, 64>}, {pipeline_mode = #tpu.pipeline_mode<synchronous>, transform_indices = @transform_2, window_bounds = array<i64: 8, 64>}, {pipeline_mode = #tpu.pipeline_mode<synchronous>, transform_indices = @transform_3, window_bounds = array<i64: 64, 64>}, {pipeline_mode = #tpu.pipeline_mode<synchronous>, transform_indices = @transform_4, window_bounds = array<i64: 64, 128>}, {pipeline_mode = #tpu.pipeline_mode<synchronous>, transform_indices = @transform_5, window_bounds = array<i64: 1, 128>}, {pipeline_mode = #tpu.pipeline_mode<synchronous>, transform_indices = @transform_6, window_bounds = array<i64: 64, 64>}, {pipeline_mode = #tpu.pipeline_mode<synchronous>, transform_indices = @transform_7, window_bounds = array<i64: 64, 256>}, {pipeline_mode = #tpu.pipeline_mode<synchronous>, transform_indices = @transform_8, window_bounds = array<i64: 1, 256>}, {pipeline_mode = #tpu.pipeline_mode<synchronous>, transform_indices = @transform_9, window_bounds = array<i64: 256, 64>}, {transform_indices = @transform_10, window_bounds = array<i64: 16, 64>}]} {
    %c0 = arith.constant 0 : index
    %c0_0 = arith.constant 0 : index
    %0 = vector.load %arg1[%c0, %c0_0] : memref<16x64xf32, #tpu.memory_space<vmem>>, vector<16x64xf32>
    %c0_1 = arith.constant 0 : index
    %c0_2 = arith.constant 0 : index
    %1 = vector.load %arg2[%c0_1, %c0_2] : memref<16x64xf32, #tpu.memory_space<vmem>>, vector<16x64xf32>
    %c0_3 = arith.constant 0 : index
    %c0_4 = arith.constant 0 : index
    %2 = vector.load %arg3[%c0_3, %c0_4] : memref<8x64xf32, #tpu.memory_space<vmem>>, vector<8x64xf32>
    %3 = vector.extract_strided_slice %2 {offsets = [0, 0], sizes = [1, 64], strides = [1, 1]} : vector<8x64xf32> to vector<1x64xf32>
    %4 = vector.extract_strided_slice %2 {offsets = [1, 0], sizes = [1, 64], strides = [1, 1]} : vector<8x64xf32> to vector<1x64xf32>
    %5 = vector.extract_strided_slice %2 {offsets = [2, 0], sizes = [1, 64], strides = [1, 1]} : vector<8x64xf32> to vector<1x64xf32>
    %6 = vector.extract_strided_slice %2 {offsets = [3, 0], sizes = [1, 64], strides = [1, 1]} : vector<8x64xf32> to vector<1x64xf32>
    %7 = vector.extract_strided_slice %2 {offsets = [4, 0], sizes = [1, 64], strides = [1, 1]} : vector<8x64xf32> to vector<1x64xf32>
    %8 = vector.extract_strided_slice %2 {offsets = [5, 0], sizes = [1, 64], strides = [1, 1]} : vector<8x64xf32> to vector<1x64xf32>
    %9 = vector.extract_strided_slice %2 {offsets = [6, 0], sizes = [1, 64], strides = [1, 1]} : vector<8x64xf32> to vector<1x64xf32>
    %cst = arith.constant dense<0.000000e+00> : vector<16xf32>
    %10 = vector.multi_reduction <add>, %0, %cst [1] : vector<16x64xf32> to vector<16xf32>
    %11 = vector.shape_cast %10 : vector<16xf32> to vector<16x1xf32>
    %cst_5 = arith.constant 6.400000e+01 : f32
    %12 = vector.broadcast %cst_5 : f32 to vector<16x1xf32>
    %13 = arith.divf %11, %12 : vector<16x1xf32>
    %14 = vector.broadcast %13 : vector<16x1xf32> to vector<16x64xf32>
    %15 = arith.subf %0, %14 : vector<16x64xf32>
    %16 = arith.mulf %15, %15 : vector<16x64xf32>
    %cst_6 = arith.constant dense<0.000000e+00> : vector<16xf32>
    %17 = vector.multi_reduction <add>, %16, %cst_6 [1] : vector<16x64xf32> to vector<16xf32>
    %18 = vector.shape_cast %17 : vector<16xf32> to vector<16x1xf32>
    %cst_7 = arith.constant 6.400000e+01 : f32
    %19 = vector.broadcast %cst_7 : f32 to vector<16x1xf32>
    %20 = arith.divf %18, %19 : vector<16x1xf32>
    %21 = vector.broadcast %13 : vector<16x1xf32> to vector<16x64xf32>
    %22 = arith.subf %0, %21 : vector<16x64xf32>
    %cst_8 = arith.constant 9.99999974E-6 : f32
    %23 = vector.broadcast %cst_8 : f32 to vector<16x1xf32>
    %24 = arith.addf %20, %23 : vector<16x1xf32>
    %25 = math.rsqrt %24 : vector<16x1xf32>
    %26 = vector.broadcast %25 : vector<16x1xf32> to vector<16x64xf32>
    %27 = arith.mulf %22, %26 : vector<16x64xf32>
    %28 = vector.broadcast %3 : vector<1x64xf32> to vector<16x64xf32>
    %29 = arith.mulf %27, %28 : vector<16x64xf32>
    %30 = vector.broadcast %4 : vector<1x64xf32> to vector<16x64xf32>
    %31 = arith.addf %29, %30 : vector<16x64xf32>
    %cst_9 = arith.constant dense<0.000000e+00> : vector<16xf32>
    %32 = vector.multi_reduction <add>, %1, %cst_9 [1] : vector<16x64xf32> to vector<16xf32>
    %33 = vector.shape_cast %32 : vector<16xf32> to vector<16x1xf32>
    %cst_10 = arith.constant 6.400000e+01 : f32
    %34 = vector.broadcast %cst_10 : f32 to vector<16x1xf32>
    %35 = arith.divf %33, %34 : vector<16x1xf32>
    %36 = vector.broadcast %35 : vector<16x1xf32> to vector<16x64xf32>
    %37 = arith.subf %1, %36 : vector<16x64xf32>
    %38 = arith.mulf %37, %37 : vector<16x64xf32>
    %cst_11 = arith.constant dense<0.000000e+00> : vector<16xf32>
    %39 = vector.multi_reduction <add>, %38, %cst_11 [1] : vector<16x64xf32> to vector<16xf32>
    %40 = vector.shape_cast %39 : vector<16xf32> to vector<16x1xf32>
    %cst_12 = arith.constant 6.400000e+01 : f32
    %41 = vector.broadcast %cst_12 : f32 to vector<16x1xf32>
    %42 = arith.divf %40, %41 : vector<16x1xf32>
    %43 = vector.broadcast %35 : vector<16x1xf32> to vector<16x64xf32>
    %44 = arith.subf %1, %43 : vector<16x64xf32>
    %cst_13 = arith.constant 9.99999974E-6 : f32
    %45 = vector.broadcast %cst_13 : f32 to vector<16x1xf32>
    %46 = arith.addf %42, %45 : vector<16x1xf32>
    %47 = math.rsqrt %46 : vector<16x1xf32>
    %48 = vector.broadcast %47 : vector<16x1xf32> to vector<16x64xf32>
    %49 = arith.mulf %44, %48 : vector<16x64xf32>
    %50 = vector.broadcast %3 : vector<1x64xf32> to vector<16x64xf32>
    %51 = arith.mulf %49, %50 : vector<16x64xf32>
    %52 = vector.broadcast %4 : vector<1x64xf32> to vector<16x64xf32>
    %53 = arith.addf %51, %52 : vector<16x64xf32>
    %54 = arith.truncf %31 : vector<16x64xf32> to vector<16x64xbf16>
    %c0_14 = arith.constant 0 : index
    %c0_15 = arith.constant 0 : index
    %55 = vector.load %arg4[%c0_14, %c0_15] : memref<64x64xbf16, #tpu.memory_space<vmem>>, vector<64x64xbf16>
    %cst_16 = arith.constant dense<0.000000e+00> : vector<16x64xf32>
    %56 = tpu.matmul %54, %55, %cst_16 {dimension_numbers = #tpu.dot_dimension_numbers<[1], [0], [0], [1], [0, 0, 1, 1], [], []>} : vector<16x64xbf16>, vector<64x64xbf16>, vector<16x64xf32> -> vector<16x64xf32>
    %57 = vector.broadcast %5 : vector<1x64xf32> to vector<16x64xf32>
    %58 = arith.addf %56, %57 : vector<16x64xf32>
    %59 = arith.truncf %53 : vector<16x64xf32> to vector<16x64xbf16>
    %c0_17 = arith.constant 0 : index
    %c0_18 = arith.constant 0 : index
    %60 = vector.load %arg5[%c0_17, %c0_18] : memref<64x128xbf16, #tpu.memory_space<vmem>>, vector<64x128xbf16>
    %cst_19 = arith.constant dense<0.000000e+00> : vector<16x128xf32>
    %61 = tpu.matmul %59, %60, %cst_19 {dimension_numbers = #tpu.dot_dimension_numbers<[1], [0], [0], [1], [0, 0, 1, 1], [], []>} : vector<16x64xbf16>, vector<64x128xbf16>, vector<16x128xf32> -> vector<16x128xf32>
    %c0_20 = arith.constant 0 : index
    %c0_21 = arith.constant 0 : index
    %62 = vector.load %arg6[%c0_20, %c0_21] : memref<1x128xf32, #tpu.memory_space<vmem>>, vector<1x128xf32>
    %63 = vector.broadcast %62 : vector<1x128xf32> to vector<16x128xf32>
    %64 = arith.addf %61, %63 : vector<16x128xf32>
    %65 = arith.truncf %58 : vector<16x64xf32> to vector<16x64xbf16>
    %66 = vector.extract_strided_slice %64 {offsets = [0, 0], sizes = [16, 64], strides = [1, 1]} : vector<16x128xf32> to vector<16x64xf32>
    %67 = arith.truncf %66 : vector<16x64xf32> to vector<16x64xbf16>
    %68 = vector.extract_strided_slice %64 {offsets = [0, 64], sizes = [16, 64], strides = [1, 1]} : vector<16x128xf32> to vector<16x64xf32>
    %69 = arith.truncf %68 : vector<16x64xf32> to vector<16x64xbf16>
    %70 = vector.extract_strided_slice %65 {offsets = [0, 0], sizes = [16, 8], strides = [1, 1]} : vector<16x64xbf16> to vector<16x8xbf16>
    %71 = vector.shape_cast %70 : vector<16x8xbf16> to vector<2x8x8xbf16>
    %72 = vector.extract_strided_slice %67 {offsets = [0, 0], sizes = [16, 8], strides = [1, 1]} : vector<16x64xbf16> to vector<16x8xbf16>
    %73 = vector.shape_cast %72 : vector<16x8xbf16> to vector<2x8x8xbf16>
    %74 = vector.extract_strided_slice %69 {offsets = [0, 0], sizes = [16, 8], strides = [1, 1]} : vector<16x64xbf16> to vector<16x8xbf16>
    %75 = vector.shape_cast %74 : vector<16x8xbf16> to vector<2x8x8xbf16>
    "tpu.trace_start"() <{level = 10 : i32, message = "bqd,bkd->bqk"}> : () -> ()
    %cst_22 = arith.constant dense<0.000000e+00> : vector<2x8x8xf32>
    %76 = tpu.matmul %71, %73, %cst_22 {dimension_numbers = #tpu.dot_dimension_numbers<[2], [2], [1], [1], [0, 0, 0, 1, 1, 1], [0], [0]>} : vector<2x8x8xbf16>, vector<2x8x8xbf16>, vector<2x8x8xf32> -> vector<2x8x8xf32>
    "tpu.trace_stop"() : () -> ()
    %cst_23 = arith.constant 0.353553385 : f32
    %77 = vector.broadcast %cst_23 : f32 to vector<2x8x8xf32>
    %78 = arith.mulf %76, %77 : vector<2x8x8xf32>
    %cst_24 = arith.constant dense<0xFF800000> : vector<2x8xf32>
    %79 = vector.multi_reduction <maximumf>, %78, %cst_24 [2] : vector<2x8x8xf32> to vector<2x8xf32>
    %80 = vector.shape_cast %79 : vector<2x8xf32> to vector<2x8x1xf32>
    %81 = vector.broadcast %80 : vector<2x8x1xf32> to vector<2x8x8xf32>
    %82 = arith.subf %78, %81 : vector<2x8x8xf32>
    %83 = math.exp %82 : vector<2x8x8xf32>
    %cst_25 = arith.constant dense<0.000000e+00> : vector<2x8xf32>
    %84 = vector.multi_reduction <add>, %83, %cst_25 [2] : vector<2x8x8xf32> to vector<2x8xf32>
    %85 = vector.shape_cast %84 : vector<2x8xf32> to vector<2x8x1xf32>
    %86 = tpu.reciprocal %85 {approx = true} : vector<2x8x1xf32> -> vector<2x8x1xf32>
    %87 = vector.broadcast %86 : vector<2x8x1xf32> to vector<2x8x8xf32>
    %88 = arith.mulf %83, %87 : vector<2x8x8xf32>
    %89 = arith.truncf %88 : vector<2x8x8xf32> to vector<2x8x8xbf16>
    "tpu.trace_start"() <{level = 10 : i32, message = "bqk,bkd->bqd"}> : () -> ()
    %cst_26 = arith.constant dense<0.000000e+00> : vector<2x8x8xf32>
    %90 = tpu.matmul %89, %75, %cst_26 {dimension_numbers = #tpu.dot_dimension_numbers<[2], [1], [1], [2], [0, 0, 0, 1, 1, 2], [0], [0]>} : vector<2x8x8xbf16>, vector<2x8x8xbf16>, vector<2x8x8xf32> -> vector<2x8x8xf32>
    "tpu.trace_stop"() : () -> ()
    %91 = vector.shape_cast %90 : vector<2x8x8xf32> to vector<16x8xf32>
    %92 = arith.truncf %91 : vector<16x8xf32> to vector<16x8xbf16>
    %c0_27 = arith.constant 0 : index
    %c0_28 = arith.constant 0 : index
    %93 = vector.load %arg7[%c0_27, %c0_28] : memref<64x64xbf16, #tpu.memory_space<vmem>>, vector<8x64xbf16>
    %cst_29 = arith.constant dense<0.000000e+00> : vector<16x64xf32>
    %94 = tpu.matmul %92, %93, %cst_29 {dimension_numbers = #tpu.dot_dimension_numbers<[1], [0], [0], [1], [0, 0, 1, 1], [], []>} : vector<16x8xbf16>, vector<8x64xbf16>, vector<16x64xf32> -> vector<16x64xf32>
    %95 = vector.extract_strided_slice %65 {offsets = [0, 8], sizes = [16, 8], strides = [1, 1]} : vector<16x64xbf16> to vector<16x8xbf16>
    %96 = vector.shape_cast %95 : vector<16x8xbf16> to vector<2x8x8xbf16>
    %97 = vector.extract_strided_slice %67 {offsets = [0, 8], sizes = [16, 8], strides = [1, 1]} : vector<16x64xbf16> to vector<16x8xbf16>
    %98 = vector.shape_cast %97 : vector<16x8xbf16> to vector<2x8x8xbf16>
    %99 = vector.extract_strided_slice %69 {offsets = [0, 8], sizes = [16, 8], strides = [1, 1]} : vector<16x64xbf16> to vector<16x8xbf16>
    %100 = vector.shape_cast %99 : vector<16x8xbf16> to vector<2x8x8xbf16>
    "tpu.trace_start"() <{level = 10 : i32, message = "bqd,bkd->bqk"}> : () -> ()
    %cst_30 = arith.constant dense<0.000000e+00> : vector<2x8x8xf32>
    %101 = tpu.matmul %96, %98, %cst_30 {dimension_numbers = #tpu.dot_dimension_numbers<[2], [2], [1], [1], [0, 0, 0, 1, 1, 1], [0], [0]>} : vector<2x8x8xbf16>, vector<2x8x8xbf16>, vector<2x8x8xf32> -> vector<2x8x8xf32>
    "tpu.trace_stop"() : () -> ()
    %cst_31 = arith.constant 0.353553385 : f32
    %102 = vector.broadcast %cst_31 : f32 to vector<2x8x8xf32>
    %103 = arith.mulf %101, %102 : vector<2x8x8xf32>
    %cst_32 = arith.constant dense<0xFF800000> : vector<2x8xf32>
    %104 = vector.multi_reduction <maximumf>, %103, %cst_32 [2] : vector<2x8x8xf32> to vector<2x8xf32>
    %105 = vector.shape_cast %104 : vector<2x8xf32> to vector<2x8x1xf32>
    %106 = vector.broadcast %105 : vector<2x8x1xf32> to vector<2x8x8xf32>
    %107 = arith.subf %103, %106 : vector<2x8x8xf32>
    %108 = math.exp %107 : vector<2x8x8xf32>
    %cst_33 = arith.constant dense<0.000000e+00> : vector<2x8xf32>
    %109 = vector.multi_reduction <add>, %108, %cst_33 [2] : vector<2x8x8xf32> to vector<2x8xf32>
    %110 = vector.shape_cast %109 : vector<2x8xf32> to vector<2x8x1xf32>
    %111 = tpu.reciprocal %110 {approx = true} : vector<2x8x1xf32> -> vector<2x8x1xf32>
    %112 = vector.broadcast %111 : vector<2x8x1xf32> to vector<2x8x8xf32>
    %113 = arith.mulf %108, %112 : vector<2x8x8xf32>
    %114 = arith.truncf %113 : vector<2x8x8xf32> to vector<2x8x8xbf16>
    "tpu.trace_start"() <{level = 10 : i32, message = "bqk,bkd->bqd"}> : () -> ()
    %cst_34 = arith.constant dense<0.000000e+00> : vector<2x8x8xf32>
    %115 = tpu.matmul %114, %100, %cst_34 {dimension_numbers = #tpu.dot_dimension_numbers<[2], [1], [1], [2], [0, 0, 0, 1, 1, 2], [0], [0]>} : vector<2x8x8xbf16>, vector<2x8x8xbf16>, vector<2x8x8xf32> -> vector<2x8x8xf32>
    "tpu.trace_stop"() : () -> ()
    %116 = vector.shape_cast %115 : vector<2x8x8xf32> to vector<16x8xf32>
    %117 = arith.truncf %116 : vector<16x8xf32> to vector<16x8xbf16>
    %c8 = arith.constant 8 : index
    %c0_35 = arith.constant 0 : index
    %118 = vector.load %arg7[%c8, %c0_35] : memref<64x64xbf16, #tpu.memory_space<vmem>>, vector<8x64xbf16>
    %cst_36 = arith.constant dense<0.000000e+00> : vector<16x64xf32>
    %119 = tpu.matmul %117, %118, %cst_36 {dimension_numbers = #tpu.dot_dimension_numbers<[1], [0], [0], [1], [0, 0, 1, 1], [], []>} : vector<16x8xbf16>, vector<8x64xbf16>, vector<16x64xf32> -> vector<16x64xf32>
    %120 = arith.addf %94, %119 : vector<16x64xf32>
    %121 = vector.extract_strided_slice %65 {offsets = [0, 16], sizes = [16, 8], strides = [1, 1]} : vector<16x64xbf16> to vector<16x8xbf16>
    %122 = vector.shape_cast %121 : vector<16x8xbf16> to vector<2x8x8xbf16>
    %123 = vector.extract_strided_slice %67 {offsets = [0, 16], sizes = [16, 8], strides = [1, 1]} : vector<16x64xbf16> to vector<16x8xbf16>
    %124 = vector.shape_cast %123 : vector<16x8xbf16> to vector<2x8x8xbf16>
    %125 = vector.extract_strided_slice %69 {offsets = [0, 16], sizes = [16, 8], strides = [1, 1]} : vector<16x64xbf16> to vector<16x8xbf16>
    %126 = vector.shape_cast %125 : vector<16x8xbf16> to vector<2x8x8xbf16>
    "tpu.trace_start"() <{level = 10 : i32, message = "bqd,bkd->bqk"}> : () -> ()
    %cst_37 = arith.constant dense<0.000000e+00> : vector<2x8x8xf32>
    %127 = tpu.matmul %122, %124, %cst_37 {dimension_numbers = #tpu.dot_dimension_numbers<[2], [2], [1], [1], [0, 0, 0, 1, 1, 1], [0], [0]>} : vector<2x8x8xbf16>, vector<2x8x8xbf16>, vector<2x8x8xf32> -> vector<2x8x8xf32>
    "tpu.trace_stop"() : () -> ()
    %cst_38 = arith.constant 0.353553385 : f32
    %128 = vector.broadcast %cst_38 : f32 to vector<2x8x8xf32>
    %129 = arith.mulf %127, %128 : vector<2x8x8xf32>
    %cst_39 = arith.constant dense<0xFF800000> : vector<2x8xf32>
    %130 = vector.multi_reduction <maximumf>, %129, %cst_39 [2] : vector<2x8x8xf32> to vector<2x8xf32>
    %131 = vector.shape_cast %130 : vector<2x8xf32> to vector<2x8x1xf32>
    %132 = vector.broadcast %131 : vector<2x8x1xf32> to vector<2x8x8xf32>
    %133 = arith.subf %129, %132 : vector<2x8x8xf32>
    %134 = math.exp %133 : vector<2x8x8xf32>
    %cst_40 = arith.constant dense<0.000000e+00> : vector<2x8xf32>
    %135 = vector.multi_reduction <add>, %134, %cst_40 [2] : vector<2x8x8xf32> to vector<2x8xf32>
    %136 = vector.shape_cast %135 : vector<2x8xf32> to vector<2x8x1xf32>
    %137 = tpu.reciprocal %136 {approx = true} : vector<2x8x1xf32> -> vector<2x8x1xf32>
    %138 = vector.broadcast %137 : vector<2x8x1xf32> to vector<2x8x8xf32>
    %139 = arith.mulf %134, %138 : vector<2x8x8xf32>
    %140 = arith.truncf %139 : vector<2x8x8xf32> to vector<2x8x8xbf16>
    "tpu.trace_start"() <{level = 10 : i32, message = "bqk,bkd->bqd"}> : () -> ()
    %cst_41 = arith.constant dense<0.000000e+00> : vector<2x8x8xf32>
    %141 = tpu.matmul %140, %126, %cst_41 {dimension_numbers = #tpu.dot_dimension_numbers<[2], [1], [1], [2], [0, 0, 0, 1, 1, 2], [0], [0]>} : vector<2x8x8xbf16>, vector<2x8x8xbf16>, vector<2x8x8xf32> -> vector<2x8x8xf32>
    "tpu.trace_stop"() : () -> ()
    %142 = vector.shape_cast %141 : vector<2x8x8xf32> to vector<16x8xf32>
    %143 = arith.truncf %142 : vector<16x8xf32> to vector<16x8xbf16>
    %c16 = arith.constant 16 : index
    %c0_42 = arith.constant 0 : index
    %144 = vector.load %arg7[%c16, %c0_42] : memref<64x64xbf16, #tpu.memory_space<vmem>>, vector<8x64xbf16>
    %cst_43 = arith.constant dense<0.000000e+00> : vector<16x64xf32>
    %145 = tpu.matmul %143, %144, %cst_43 {dimension_numbers = #tpu.dot_dimension_numbers<[1], [0], [0], [1], [0, 0, 1, 1], [], []>} : vector<16x8xbf16>, vector<8x64xbf16>, vector<16x64xf32> -> vector<16x64xf32>
    %146 = arith.addf %120, %145 : vector<16x64xf32>
    %147 = vector.extract_strided_slice %65 {offsets = [0, 24], sizes = [16, 8], strides = [1, 1]} : vector<16x64xbf16> to vector<16x8xbf16>
    %148 = vector.shape_cast %147 : vector<16x8xbf16> to vector<2x8x8xbf16>
    %149 = vector.extract_strided_slice %67 {offsets = [0, 24], sizes = [16, 8], strides = [1, 1]} : vector<16x64xbf16> to vector<16x8xbf16>
    %150 = vector.shape_cast %149 : vector<16x8xbf16> to vector<2x8x8xbf16>
    %151 = vector.extract_strided_slice %69 {offsets = [0, 24], sizes = [16, 8], strides = [1, 1]} : vector<16x64xbf16> to vector<16x8xbf16>
    %152 = vector.shape_cast %151 : vector<16x8xbf16> to vector<2x8x8xbf16>
    "tpu.trace_start"() <{level = 10 : i32, message = "bqd,bkd->bqk"}> : () -> ()
    %cst_44 = arith.constant dense<0.000000e+00> : vector<2x8x8xf32>
    %153 = tpu.matmul %148, %150, %cst_44 {dimension_numbers = #tpu.dot_dimension_numbers<[2], [2], [1], [1], [0, 0, 0, 1, 1, 1], [0], [0]>} : vector<2x8x8xbf16>, vector<2x8x8xbf16>, vector<2x8x8xf32> -> vector<2x8x8xf32>
    "tpu.trace_stop"() : () -> ()
    %cst_45 = arith.constant 0.353553385 : f32
    %154 = vector.broadcast %cst_45 : f32 to vector<2x8x8xf32>
    %155 = arith.mulf %153, %154 : vector<2x8x8xf32>
    %cst_46 = arith.constant dense<0xFF800000> : vector<2x8xf32>
    %156 = vector.multi_reduction <maximumf>, %155, %cst_46 [2] : vector<2x8x8xf32> to vector<2x8xf32>
    %157 = vector.shape_cast %156 : vector<2x8xf32> to vector<2x8x1xf32>
    %158 = vector.broadcast %157 : vector<2x8x1xf32> to vector<2x8x8xf32>
    %159 = arith.subf %155, %158 : vector<2x8x8xf32>
    %160 = math.exp %159 : vector<2x8x8xf32>
    %cst_47 = arith.constant dense<0.000000e+00> : vector<2x8xf32>
    %161 = vector.multi_reduction <add>, %160, %cst_47 [2] : vector<2x8x8xf32> to vector<2x8xf32>
    %162 = vector.shape_cast %161 : vector<2x8xf32> to vector<2x8x1xf32>
    %163 = tpu.reciprocal %162 {approx = true} : vector<2x8x1xf32> -> vector<2x8x1xf32>
    %164 = vector.broadcast %163 : vector<2x8x1xf32> to vector<2x8x8xf32>
    %165 = arith.mulf %160, %164 : vector<2x8x8xf32>
    %166 = arith.truncf %165 : vector<2x8x8xf32> to vector<2x8x8xbf16>
    "tpu.trace_start"() <{level = 10 : i32, message = "bqk,bkd->bqd"}> : () -> ()
    %cst_48 = arith.constant dense<0.000000e+00> : vector<2x8x8xf32>
    %167 = tpu.matmul %166, %152, %cst_48 {dimension_numbers = #tpu.dot_dimension_numbers<[2], [1], [1], [2], [0, 0, 0, 1, 1, 2], [0], [0]>} : vector<2x8x8xbf16>, vector<2x8x8xbf16>, vector<2x8x8xf32> -> vector<2x8x8xf32>
    "tpu.trace_stop"() : () -> ()
    %168 = vector.shape_cast %167 : vector<2x8x8xf32> to vector<16x8xf32>
    %169 = arith.truncf %168 : vector<16x8xf32> to vector<16x8xbf16>
    %c24 = arith.constant 24 : index
    %c0_49 = arith.constant 0 : index
    %170 = vector.load %arg7[%c24, %c0_49] : memref<64x64xbf16, #tpu.memory_space<vmem>>, vector<8x64xbf16>
    %cst_50 = arith.constant dense<0.000000e+00> : vector<16x64xf32>
    %171 = tpu.matmul %169, %170, %cst_50 {dimension_numbers = #tpu.dot_dimension_numbers<[1], [0], [0], [1], [0, 0, 1, 1], [], []>} : vector<16x8xbf16>, vector<8x64xbf16>, vector<16x64xf32> -> vector<16x64xf32>
    %172 = arith.addf %146, %171 : vector<16x64xf32>
    %173 = vector.extract_strided_slice %65 {offsets = [0, 32], sizes = [16, 8], strides = [1, 1]} : vector<16x64xbf16> to vector<16x8xbf16>
    %174 = vector.shape_cast %173 : vector<16x8xbf16> to vector<2x8x8xbf16>
    %175 = vector.extract_strided_slice %67 {offsets = [0, 32], sizes = [16, 8], strides = [1, 1]} : vector<16x64xbf16> to vector<16x8xbf16>
    %176 = vector.shape_cast %175 : vector<16x8xbf16> to vector<2x8x8xbf16>
    %177 = vector.extract_strided_slice %69 {offsets = [0, 32], sizes = [16, 8], strides = [1, 1]} : vector<16x64xbf16> to vector<16x8xbf16>
    %178 = vector.shape_cast %177 : vector<16x8xbf16> to vector<2x8x8xbf16>
    "tpu.trace_start"() <{level = 10 : i32, message = "bqd,bkd->bqk"}> : () -> ()
    %cst_51 = arith.constant dense<0.000000e+00> : vector<2x8x8xf32>
    %179 = tpu.matmul %174, %176, %cst_51 {dimension_numbers = #tpu.dot_dimension_numbers<[2], [2], [1], [1], [0, 0, 0, 1, 1, 1], [0], [0]>} : vector<2x8x8xbf16>, vector<2x8x8xbf16>, vector<2x8x8xf32> -> vector<2x8x8xf32>
    "tpu.trace_stop"() : () -> ()
    %cst_52 = arith.constant 0.353553385 : f32
    %180 = vector.broadcast %cst_52 : f32 to vector<2x8x8xf32>
    %181 = arith.mulf %179, %180 : vector<2x8x8xf32>
    %cst_53 = arith.constant dense<0xFF800000> : vector<2x8xf32>
    %182 = vector.multi_reduction <maximumf>, %181, %cst_53 [2] : vector<2x8x8xf32> to vector<2x8xf32>
    %183 = vector.shape_cast %182 : vector<2x8xf32> to vector<2x8x1xf32>
    %184 = vector.broadcast %183 : vector<2x8x1xf32> to vector<2x8x8xf32>
    %185 = arith.subf %181, %184 : vector<2x8x8xf32>
    %186 = math.exp %185 : vector<2x8x8xf32>
    %cst_54 = arith.constant dense<0.000000e+00> : vector<2x8xf32>
    %187 = vector.multi_reduction <add>, %186, %cst_54 [2] : vector<2x8x8xf32> to vector<2x8xf32>
    %188 = vector.shape_cast %187 : vector<2x8xf32> to vector<2x8x1xf32>
    %189 = tpu.reciprocal %188 {approx = true} : vector<2x8x1xf32> -> vector<2x8x1xf32>
    %190 = vector.broadcast %189 : vector<2x8x1xf32> to vector<2x8x8xf32>
    %191 = arith.mulf %186, %190 : vector<2x8x8xf32>
    %192 = arith.truncf %191 : vector<2x8x8xf32> to vector<2x8x8xbf16>
    "tpu.trace_start"() <{level = 10 : i32, message = "bqk,bkd->bqd"}> : () -> ()
    %cst_55 = arith.constant dense<0.000000e+00> : vector<2x8x8xf32>
    %193 = tpu.matmul %192, %178, %cst_55 {dimension_numbers = #tpu.dot_dimension_numbers<[2], [1], [1], [2], [0, 0, 0, 1, 1, 2], [0], [0]>} : vector<2x8x8xbf16>, vector<2x8x8xbf16>, vector<2x8x8xf32> -> vector<2x8x8xf32>
    "tpu.trace_stop"() : () -> ()
    %194 = vector.shape_cast %193 : vector<2x8x8xf32> to vector<16x8xf32>
    %195 = arith.truncf %194 : vector<16x8xf32> to vector<16x8xbf16>
    %c32 = arith.constant 32 : index
    %c0_56 = arith.constant 0 : index
    %196 = vector.load %arg7[%c32, %c0_56] : memref<64x64xbf16, #tpu.memory_space<vmem>>, vector<8x64xbf16>
    %cst_57 = arith.constant dense<0.000000e+00> : vector<16x64xf32>
    %197 = tpu.matmul %195, %196, %cst_57 {dimension_numbers = #tpu.dot_dimension_numbers<[1], [0], [0], [1], [0, 0, 1, 1], [], []>} : vector<16x8xbf16>, vector<8x64xbf16>, vector<16x64xf32> -> vector<16x64xf32>
    %198 = arith.addf %172, %197 : vector<16x64xf32>
    %199 = vector.extract_strided_slice %65 {offsets = [0, 40], sizes = [16, 8], strides = [1, 1]} : vector<16x64xbf16> to vector<16x8xbf16>
    %200 = vector.shape_cast %199 : vector<16x8xbf16> to vector<2x8x8xbf16>
    %201 = vector.extract_strided_slice %67 {offsets = [0, 40], sizes = [16, 8], strides = [1, 1]} : vector<16x64xbf16> to vector<16x8xbf16>
    %202 = vector.shape_cast %201 : vector<16x8xbf16> to vector<2x8x8xbf16>
    %203 = vector.extract_strided_slice %69 {offsets = [0, 40], sizes = [16, 8], strides = [1, 1]} : vector<16x64xbf16> to vector<16x8xbf16>
    %204 = vector.shape_cast %203 : vector<16x8xbf16> to vector<2x8x8xbf16>
    "tpu.trace_start"() <{level = 10 : i32, message = "bqd,bkd->bqk"}> : () -> ()
    %cst_58 = arith.constant dense<0.000000e+00> : vector<2x8x8xf32>
    %205 = tpu.matmul %200, %202, %cst_58 {dimension_numbers = #tpu.dot_dimension_numbers<[2], [2], [1], [1], [0, 0, 0, 1, 1, 1], [0], [0]>} : vector<2x8x8xbf16>, vector<2x8x8xbf16>, vector<2x8x8xf32> -> vector<2x8x8xf32>
    "tpu.trace_stop"() : () -> ()
    %cst_59 = arith.constant 0.353553385 : f32
    %206 = vector.broadcast %cst_59 : f32 to vector<2x8x8xf32>
    %207 = arith.mulf %205, %206 : vector<2x8x8xf32>
    %cst_60 = arith.constant dense<0xFF800000> : vector<2x8xf32>
    %208 = vector.multi_reduction <maximumf>, %207, %cst_60 [2] : vector<2x8x8xf32> to vector<2x8xf32>
    %209 = vector.shape_cast %208 : vector<2x8xf32> to vector<2x8x1xf32>
    %210 = vector.broadcast %209 : vector<2x8x1xf32> to vector<2x8x8xf32>
    %211 = arith.subf %207, %210 : vector<2x8x8xf32>
    %212 = math.exp %211 : vector<2x8x8xf32>
    %cst_61 = arith.constant dense<0.000000e+00> : vector<2x8xf32>
    %213 = vector.multi_reduction <add>, %212, %cst_61 [2] : vector<2x8x8xf32> to vector<2x8xf32>
    %214 = vector.shape_cast %213 : vector<2x8xf32> to vector<2x8x1xf32>
    %215 = tpu.reciprocal %214 {approx = true} : vector<2x8x1xf32> -> vector<2x8x1xf32>
    %216 = vector.broadcast %215 : vector<2x8x1xf32> to vector<2x8x8xf32>
    %217 = arith.mulf %212, %216 : vector<2x8x8xf32>
    %218 = arith.truncf %217 : vector<2x8x8xf32> to vector<2x8x8xbf16>
    "tpu.trace_start"() <{level = 10 : i32, message = "bqk,bkd->bqd"}> : () -> ()
    %cst_62 = arith.constant dense<0.000000e+00> : vector<2x8x8xf32>
    %219 = tpu.matmul %218, %204, %cst_62 {dimension_numbers = #tpu.dot_dimension_numbers<[2], [1], [1], [2], [0, 0, 0, 1, 1, 2], [0], [0]>} : vector<2x8x8xbf16>, vector<2x8x8xbf16>, vector<2x8x8xf32> -> vector<2x8x8xf32>
    "tpu.trace_stop"() : () -> ()
    %220 = vector.shape_cast %219 : vector<2x8x8xf32> to vector<16x8xf32>
    %221 = arith.truncf %220 : vector<16x8xf32> to vector<16x8xbf16>
    %c40 = arith.constant 40 : index
    %c0_63 = arith.constant 0 : index
    %222 = vector.load %arg7[%c40, %c0_63] : memref<64x64xbf16, #tpu.memory_space<vmem>>, vector<8x64xbf16>
    %cst_64 = arith.constant dense<0.000000e+00> : vector<16x64xf32>
    %223 = tpu.matmul %221, %222, %cst_64 {dimension_numbers = #tpu.dot_dimension_numbers<[1], [0], [0], [1], [0, 0, 1, 1], [], []>} : vector<16x8xbf16>, vector<8x64xbf16>, vector<16x64xf32> -> vector<16x64xf32>
    %224 = arith.addf %198, %223 : vector<16x64xf32>
    %225 = vector.extract_strided_slice %65 {offsets = [0, 48], sizes = [16, 8], strides = [1, 1]} : vector<16x64xbf16> to vector<16x8xbf16>
    %226 = vector.shape_cast %225 : vector<16x8xbf16> to vector<2x8x8xbf16>
    %227 = vector.extract_strided_slice %67 {offsets = [0, 48], sizes = [16, 8], strides = [1, 1]} : vector<16x64xbf16> to vector<16x8xbf16>
    %228 = vector.shape_cast %227 : vector<16x8xbf16> to vector<2x8x8xbf16>
    %229 = vector.extract_strided_slice %69 {offsets = [0, 48], sizes = [16, 8], strides = [1, 1]} : vector<16x64xbf16> to vector<16x8xbf16>
    %230 = vector.shape_cast %229 : vector<16x8xbf16> to vector<2x8x8xbf16>
    "tpu.trace_start"() <{level = 10 : i32, message = "bqd,bkd->bqk"}> : () -> ()
    %cst_65 = arith.constant dense<0.000000e+00> : vector<2x8x8xf32>
    %231 = tpu.matmul %226, %228, %cst_65 {dimension_numbers = #tpu.dot_dimension_numbers<[2], [2], [1], [1], [0, 0, 0, 1, 1, 1], [0], [0]>} : vector<2x8x8xbf16>, vector<2x8x8xbf16>, vector<2x8x8xf32> -> vector<2x8x8xf32>
    "tpu.trace_stop"() : () -> ()
    %cst_66 = arith.constant 0.353553385 : f32
    %232 = vector.broadcast %cst_66 : f32 to vector<2x8x8xf32>
    %233 = arith.mulf %231, %232 : vector<2x8x8xf32>
    %cst_67 = arith.constant dense<0xFF800000> : vector<2x8xf32>
    %234 = vector.multi_reduction <maximumf>, %233, %cst_67 [2] : vector<2x8x8xf32> to vector<2x8xf32>
    %235 = vector.shape_cast %234 : vector<2x8xf32> to vector<2x8x1xf32>
    %236 = vector.broadcast %235 : vector<2x8x1xf32> to vector<2x8x8xf32>
    %237 = arith.subf %233, %236 : vector<2x8x8xf32>
    %238 = math.exp %237 : vector<2x8x8xf32>
    %cst_68 = arith.constant dense<0.000000e+00> : vector<2x8xf32>
    %239 = vector.multi_reduction <add>, %238, %cst_68 [2] : vector<2x8x8xf32> to vector<2x8xf32>
    %240 = vector.shape_cast %239 : vector<2x8xf32> to vector<2x8x1xf32>
    %241 = tpu.reciprocal %240 {approx = true} : vector<2x8x1xf32> -> vector<2x8x1xf32>
    %242 = vector.broadcast %241 : vector<2x8x1xf32> to vector<2x8x8xf32>
    %243 = arith.mulf %238, %242 : vector<2x8x8xf32>
    %244 = arith.truncf %243 : vector<2x8x8xf32> to vector<2x8x8xbf16>
    "tpu.trace_start"() <{level = 10 : i32, message = "bqk,bkd->bqd"}> : () -> ()
    %cst_69 = arith.constant dense<0.000000e+00> : vector<2x8x8xf32>
    %245 = tpu.matmul %244, %230, %cst_69 {dimension_numbers = #tpu.dot_dimension_numbers<[2], [1], [1], [2], [0, 0, 0, 1, 1, 2], [0], [0]>} : vector<2x8x8xbf16>, vector<2x8x8xbf16>, vector<2x8x8xf32> -> vector<2x8x8xf32>
    "tpu.trace_stop"() : () -> ()
    %246 = vector.shape_cast %245 : vector<2x8x8xf32> to vector<16x8xf32>
    %247 = arith.truncf %246 : vector<16x8xf32> to vector<16x8xbf16>
    %c48 = arith.constant 48 : index
    %c0_70 = arith.constant 0 : index
    %248 = vector.load %arg7[%c48, %c0_70] : memref<64x64xbf16, #tpu.memory_space<vmem>>, vector<8x64xbf16>
    %cst_71 = arith.constant dense<0.000000e+00> : vector<16x64xf32>
    %249 = tpu.matmul %247, %248, %cst_71 {dimension_numbers = #tpu.dot_dimension_numbers<[1], [0], [0], [1], [0, 0, 1, 1], [], []>} : vector<16x8xbf16>, vector<8x64xbf16>, vector<16x64xf32> -> vector<16x64xf32>
    %250 = arith.addf %224, %249 : vector<16x64xf32>
    %251 = vector.extract_strided_slice %65 {offsets = [0, 56], sizes = [16, 8], strides = [1, 1]} : vector<16x64xbf16> to vector<16x8xbf16>
    %252 = vector.shape_cast %251 : vector<16x8xbf16> to vector<2x8x8xbf16>
    %253 = vector.extract_strided_slice %67 {offsets = [0, 56], sizes = [16, 8], strides = [1, 1]} : vector<16x64xbf16> to vector<16x8xbf16>
    %254 = vector.shape_cast %253 : vector<16x8xbf16> to vector<2x8x8xbf16>
    %255 = vector.extract_strided_slice %69 {offsets = [0, 56], sizes = [16, 8], strides = [1, 1]} : vector<16x64xbf16> to vector<16x8xbf16>
    %256 = vector.shape_cast %255 : vector<16x8xbf16> to vector<2x8x8xbf16>
    "tpu.trace_start"() <{level = 10 : i32, message = "bqd,bkd->bqk"}> : () -> ()
    %cst_72 = arith.constant dense<0.000000e+00> : vector<2x8x8xf32>
    %257 = tpu.matmul %252, %254, %cst_72 {dimension_numbers = #tpu.dot_dimension_numbers<[2], [2], [1], [1], [0, 0, 0, 1, 1, 1], [0], [0]>} : vector<2x8x8xbf16>, vector<2x8x8xbf16>, vector<2x8x8xf32> -> vector<2x8x8xf32>
    "tpu.trace_stop"() : () -> ()
    %cst_73 = arith.constant 0.353553385 : f32
    %258 = vector.broadcast %cst_73 : f32 to vector<2x8x8xf32>
    %259 = arith.mulf %257, %258 : vector<2x8x8xf32>
    %cst_74 = arith.constant dense<0xFF800000> : vector<2x8xf32>
    %260 = vector.multi_reduction <maximumf>, %259, %cst_74 [2] : vector<2x8x8xf32> to vector<2x8xf32>
    %261 = vector.shape_cast %260 : vector<2x8xf32> to vector<2x8x1xf32>
    %262 = vector.broadcast %261 : vector<2x8x1xf32> to vector<2x8x8xf32>
    %263 = arith.subf %259, %262 : vector<2x8x8xf32>
    %264 = math.exp %263 : vector<2x8x8xf32>
    %cst_75 = arith.constant dense<0.000000e+00> : vector<2x8xf32>
    %265 = vector.multi_reduction <add>, %264, %cst_75 [2] : vector<2x8x8xf32> to vector<2x8xf32>
    %266 = vector.shape_cast %265 : vector<2x8xf32> to vector<2x8x1xf32>
    %267 = tpu.reciprocal %266 {approx = true} : vector<2x8x1xf32> -> vector<2x8x1xf32>
    %268 = vector.broadcast %267 : vector<2x8x1xf32> to vector<2x8x8xf32>
    %269 = arith.mulf %264, %268 : vector<2x8x8xf32>
    %270 = arith.truncf %269 : vector<2x8x8xf32> to vector<2x8x8xbf16>
    "tpu.trace_start"() <{level = 10 : i32, message = "bqk,bkd->bqd"}> : () -> ()
    %cst_76 = arith.constant dense<0.000000e+00> : vector<2x8x8xf32>
    %271 = tpu.matmul %270, %256, %cst_76 {dimension_numbers = #tpu.dot_dimension_numbers<[2], [1], [1], [2], [0, 0, 0, 1, 1, 2], [0], [0]>} : vector<2x8x8xbf16>, vector<2x8x8xbf16>, vector<2x8x8xf32> -> vector<2x8x8xf32>
    "tpu.trace_stop"() : () -> ()
    %272 = vector.shape_cast %271 : vector<2x8x8xf32> to vector<16x8xf32>
    %273 = arith.truncf %272 : vector<16x8xf32> to vector<16x8xbf16>
    %c56 = arith.constant 56 : index
    %c0_77 = arith.constant 0 : index
    %274 = vector.load %arg7[%c56, %c0_77] : memref<64x64xbf16, #tpu.memory_space<vmem>>, vector<8x64xbf16>
    %cst_78 = arith.constant dense<0.000000e+00> : vector<16x64xf32>
    %275 = tpu.matmul %273, %274, %cst_78 {dimension_numbers = #tpu.dot_dimension_numbers<[1], [0], [0], [1], [0, 0, 1, 1], [], []>} : vector<16x8xbf16>, vector<8x64xbf16>, vector<16x64xf32> -> vector<16x64xf32>
    %276 = arith.addf %250, %275 : vector<16x64xf32>
    %277 = vector.broadcast %6 : vector<1x64xf32> to vector<16x64xf32>
    %278 = arith.addf %276, %277 : vector<16x64xf32>
    %279 = arith.addf %0, %278 : vector<16x64xf32>
    %cst_79 = arith.constant dense<0.000000e+00> : vector<16xf32>
    %280 = vector.multi_reduction <add>, %279, %cst_79 [1] : vector<16x64xf32> to vector<16xf32>
    %281 = vector.shape_cast %280 : vector<16xf32> to vector<16x1xf32>
    %cst_80 = arith.constant 6.400000e+01 : f32
    %282 = vector.broadcast %cst_80 : f32 to vector<16x1xf32>
    %283 = arith.divf %281, %282 : vector<16x1xf32>
    %284 = vector.broadcast %283 : vector<16x1xf32> to vector<16x64xf32>
    %285 = arith.subf %279, %284 : vector<16x64xf32>
    %286 = arith.mulf %285, %285 : vector<16x64xf32>
    %cst_81 = arith.constant dense<0.000000e+00> : vector<16xf32>
    %287 = vector.multi_reduction <add>, %286, %cst_81 [1] : vector<16x64xf32> to vector<16xf32>
    %288 = vector.shape_cast %287 : vector<16xf32> to vector<16x1xf32>
    %cst_82 = arith.constant 6.400000e+01 : f32
    %289 = vector.broadcast %cst_82 : f32 to vector<16x1xf32>
    %290 = arith.divf %288, %289 : vector<16x1xf32>
    %291 = vector.broadcast %283 : vector<16x1xf32> to vector<16x64xf32>
    %292 = arith.subf %279, %291 : vector<16x64xf32>
    %cst_83 = arith.constant 9.99999974E-6 : f32
    %293 = vector.broadcast %cst_83 : f32 to vector<16x1xf32>
    %294 = arith.addf %290, %293 : vector<16x1xf32>
    %295 = math.rsqrt %294 : vector<16x1xf32>
    %296 = vector.broadcast %295 : vector<16x1xf32> to vector<16x64xf32>
    %297 = arith.mulf %292, %296 : vector<16x64xf32>
    %298 = vector.broadcast %7 : vector<1x64xf32> to vector<16x64xf32>
    %299 = arith.mulf %297, %298 : vector<16x64xf32>
    %300 = vector.broadcast %8 : vector<1x64xf32> to vector<16x64xf32>
    %301 = arith.addf %299, %300 : vector<16x64xf32>
    %302 = arith.truncf %301 : vector<16x64xf32> to vector<16x64xbf16>
    %c0_84 = arith.constant 0 : index
    %c0_85 = arith.constant 0 : index
    %303 = vector.load %arg8[%c0_84, %c0_85] : memref<64x256xbf16, #tpu.memory_space<vmem>>, vector<64x256xbf16>
    %cst_86 = arith.constant dense<0.000000e+00> : vector<16x256xf32>
    %304 = tpu.matmul %302, %303, %cst_86 {dimension_numbers = #tpu.dot_dimension_numbers<[1], [0], [0], [1], [0, 0, 1, 1], [], []>} : vector<16x64xbf16>, vector<64x256xbf16>, vector<16x256xf32> -> vector<16x256xf32>
    %c0_87 = arith.constant 0 : index
    %c0_88 = arith.constant 0 : index
    %305 = vector.load %arg9[%c0_87, %c0_88] : memref<1x256xf32, #tpu.memory_space<vmem>>, vector<1x256xf32>
    %306 = vector.broadcast %305 : vector<1x256xf32> to vector<16x256xf32>
    %307 = arith.addf %304, %306 : vector<16x256xf32>
    %cst_89 = arith.constant 5.000000e-01 : f32
    %308 = vector.broadcast %cst_89 : f32 to vector<16x256xf32>
    %309 = arith.mulf %308, %307 : vector<16x256xf32>
    %cst_90 = arith.constant 2.000000e+00 : f32
    %310 = math.sqrt %cst_90 : f32
    %cst_91 = arith.constant 1.000000e+00 : f32
    %311 = arith.divf %cst_91, %310 : f32
    %312 = vector.broadcast %311 : f32 to vector<16x256xf32>
    %313 = arith.mulf %307, %312 : vector<16x256xf32>
    %314 = math.erf %313 : vector<16x256xf32>
    %cst_92 = arith.constant 1.000000e+00 : f32
    %315 = vector.broadcast %cst_92 : f32 to vector<16x256xf32>
    %316 = arith.addf %315, %314 : vector<16x256xf32>
    %317 = arith.mulf %309, %316 : vector<16x256xf32>
    %318 = arith.truncf %317 : vector<16x256xf32> to vector<16x256xbf16>
    %c0_93 = arith.constant 0 : index
    %c0_94 = arith.constant 0 : index
    %319 = vector.load %arg10[%c0_93, %c0_94] : memref<256x64xbf16, #tpu.memory_space<vmem>>, vector<256x64xbf16>
    %cst_95 = arith.constant dense<0.000000e+00> : vector<16x64xf32>
    %320 = tpu.matmul %318, %319, %cst_95 {dimension_numbers = #tpu.dot_dimension_numbers<[1], [0], [0], [1], [0, 0, 1, 1], [], []>} : vector<16x256xbf16>, vector<256x64xbf16>, vector<16x64xf32> -> vector<16x64xf32>
    %321 = vector.broadcast %9 : vector<1x64xf32> to vector<16x64xf32>
    %322 = arith.addf %320, %321 : vector<16x64xf32>
    %323 = arith.addf %279, %322 : vector<16x64xf32>
    %c0_96 = arith.constant 0 : index
    %c0_97 = arith.constant 0 : index
    %324 = vector.load %arg11[%c0_96, %c0_97] : memref<16x64xf32, #tpu.memory_space<vmem>>, vector<16x64xf32>
    tpu.vector_store %arg11[%c0_96, %c0_97], %323 {strides = array<i32>} : memref<16x64xf32, #tpu.memory_space<vmem>>, vector<16x64xf32>,
    return
  }
  func.func @transform_0(%arg0: i32) -> (i32, i32) {
    %c0_i32 = arith.constant 0 : i32
    %c0_i32_0 = arith.constant 0 : i32
    return %arg0, %c0_i32 : i32, i32
  }
  func.func @transform_1(%arg0: i32) -> (i32, i32) {
    %c0_i32 = arith.constant 0 : i32
    %c0_i32_0 = arith.constant 0 : i32
    return %arg0, %c0_i32 : i32, i32
  }
  func.func @transform_2(%arg0: i32) -> (i32, i32) {
    %c0_i32 = arith.constant 0 : i32
    %c0_i32_0 = arith.constant 0 : i32
    %c0_i32_1 = arith.constant 0 : i32
    return %c0_i32, %c0_i32_0 : i32, i32
  }
  func.func @transform_3(%arg0: i32) -> (i32, i32) {
    %c0_i32 = arith.constant 0 : i32
    %c0_i32_0 = arith.constant 0 : i32
    %c0_i32_1 = arith.constant 0 : i32
    return %c0_i32, %c0_i32_0 : i32, i32
  }
  func.func @transform_4(%arg0: i32) -> (i32, i32) {
    %c0_i32 = arith.constant 0 : i32
    %c0_i32_0 = arith.constant 0 : i32
    %c0_i32_1 = arith.constant 0 : i32
    return %c0_i32, %c0_i32_0 : i32, i32
  }
  func.func @transform_5(%arg0: i32) -> (i32, i32) {
    %c0_i32 = arith.constant 0 : i32
    %c0_i32_0 = arith.constant 0 : i32
    %c0_i32_1 = arith.constant 0 : i32
    return %c0_i32, %c0_i32_0 : i32, i32
  }
  func.func @transform_6(%arg0: i32) -> (i32, i32) {
    %c0_i32 = arith.constant 0 : i32
    %c0_i32_0 = arith.constant 0 : i32
    %c0_i32_1 = arith.constant 0 : i32
    return %c0_i32, %c0_i32_0 : i32, i32
  }
  func.func @transform_7(%arg0: i32) -> (i32, i32) {
    %c0_i32 = arith.constant 0 : i32
    %c0_i32_0 = arith.constant 0 : i32
    %c0_i32_1 = arith.constant 0 : i32
    return %c0_i32, %c0_i32_0 : i32, i32
  }
  func.func @transform_8(%arg0: i32) -> (i32, i32) {
    %c0_i32 = arith.constant 0 : i32
    %c0_i32_0 = arith.constant 0 : i32
    %c0_i32_1 = arith.constant 0 : i32
    return %c0_i32, %c0_i32_0 : i32, i32
  }
  func.func @transform_9(%arg0: i32) -> (i32, i32) {
    %c0_i32 = arith.constant 0 : i32
    %c0_i32_0 = arith.constant 0 : i32
    %c0_i32_1 = arith.constant 0 : i32
    return %c0_i32, %c0_i32_0 : i32, i32
  }
  func.func @transform_10(%arg0: i32) -> (i32, i32) {
    %c0_i32 = arith.constant 0 : i32
    %c0_i32_0 = arith.constant 0 : i32
    return %arg0, %c0_i32 : i32, i32
  }
}

</mosaic_0001>

<bundles_post_ra>
// kernel: tpu_custom_call.1
= control target key start
LH: loop header
LB: loop body
LE: loop exit
PB: predicated region body
PF: predicated region fallthrough
CT: control target
= control target key end

     0   :  { %15 = vsyncpa [#allocation3], 0  ;;  %s4158_s0 = inlined_call_operand.vmem [shape: f32[16,64], index: 0, kind: input, shape index: {}]   ;;  %s4159_s1 = inlined_call_operand.vmem [shape: f32[16,64], index: 1, kind: input, shape index: {}]   ;;  %s4160_s2 = inlined_call_operand.hbm [shape: f32[8,64], index: 2, kind: input, shape index: {}]   ;;  %s4161_s3 = inlined_call_operand.vmem [shape: bf16[64,64], index: 3, kind: input, shape index: {}]   ;;  %s4162_s4 = inlined_call_operand.vmem [shape: bf16[64,128], index: 4, kind: input, shape index: {}]   ;;  %s4163_s5 = inlined_call_operand.vmem [shape: f32[1,128], index: 5, kind: input, shape index: {}]   ;;  %s4164_s6 = inlined_call_operand.vmem [shape: bf16[64,64], index: 6, kind: input, shape index: {}]   ;;  %s4165_s7 = inlined_call_operand.vmem [shape: bf16[64,256], index: 7, kind: input, shape index: {}]   ;;  %s4166_s8 = inlined_call_operand.vmem [shape: f32[1,256], index: 8, kind: input, shape index: {}]   ;;  %s4167_s9 = inlined_call_operand.vmem [shape: bf16[256,64], index: 9, kind: input, shape index: {}]   ;;  %s4168_s10 = inlined_call_operand.hbm [shape: f32[16,64], index: 10, kind: output, shape index: {}]  }
   0x1   :  { %16 = vsyncpa [#allocation4], 0  ;;  %s3496_s13 = smov [#allocation2]   ;;  %s3448_s17 = scalar_lea.hbm %s4160_s2, 128 }
   0x2   :  { %s27_s14 = sshll.u32 %s3496_s13, 4  ;;  %p3449_p0 = scmp.ne.s32.totalorder %s4160_s2, %s3448_s17  ;;  %s28_s14 = int_to_ptr.vmem [resolvable:$true] %s27_s14 }
   0x3   :  { %p3452_p1 = scmp.lt.u32.totalorder %s3448_s17, %s4160_s2 }
   0x5   :  { %p3454_p2 = pnand %p3452_p1, %p3449_p0 }
   0x7   :  { %3457 = shalt.err (!%p3454_p2)
}
   0x8   :  { %s3458_s22 = scalar_lea.vmem %s28_s14, 128  ;;  %p3463_p4 = scmp.lt.s32.totalorder %s28_s14, %s28_s14 }
   0x9   :  { %p3459_p3 = scmp.ne.s32.totalorder %s28_s14, %s3458_s22  ;;  %p3464_p5 = scmp.lt.s32.totalorder %s3458_s22, %s3458_s22 }
   0xb   :  { %p3465_p6 = por %p3464_p5, %p3463_p4 }
   0xd   :  { %p3466_p7 = pnand %p3465_p6, %p3459_p3 }
   0xf   :  { %3469 = shalt.err (!%p3466_p7)
}
  0x10   :  { %30 = dma.hbm_to_vmem [thread:$0]  %s4160_s2, 128, %s28_s14, [#allocation3]  }
  0x11   :  { %3492 = dma.done.wait [#allocation3], 128  }
  0x12   :  { %3493 = vsyncadd [#allocation3], 4294967168  ;;  %vm54_vm0 = vcmask 523264   ;;  %v51_v0 = vld [vmem:[%s4159_s1] sm:$0xff]  ;;  %v52_v1 = vld [vmem:[%s4159_s1 + $0x8] sm:$0xff]  ;;  %v3497_v29 = vmov 0.0   ;;  %v82_v44 = vlaneseq }
  0x13   :  { %v49_v2 = vld [vmem:[%s4158_s0] sm:$0xff]  ;;  %v94_v3 = vsel %vm54_vm0, %v51_v0, 0.0  ;;  %v97_v4 = vsel %vm54_vm0, %v52_v1, 0.0  ;;  %v50_v6 = vld [vmem:[%s4158_s0 + $0x8] sm:$0xff]  ;;  %3052 = vmatprep.subr.bf16.mxu1 %v3497_v29  ;;  %3040 = vmatprep.subr.bf16.mxu0 %v3497_v29  ;;  %v3329_v33 = vld [vmem:[%s4162_s4 + $0x10] sm:$0xff]   ;;  %vm3498_vm1 = vmmov 0  }
  0x14   :  { %v55_v5 = vsel %vm54_vm0, %v49_v2, 0.0  ;;  %95 = vadd.xlane.f32.xlu0 %v94_v3  ;;  %v58_v7 = vsel %vm54_vm0, %v50_v6, 0.0  ;;  %v3325_v28 = vld [vmem:[%s4162_s4] sm:$0xff]   ;;  %v3327_v31 = vld [vmem:[%s4162_s4 + $0x8] sm:$0xff]   ;;  %v3330_v34 = vld [vmem:[%s4161_s3 + $0x10] sm:$0xff]   ;;  %3060 = vmatprep.mubr.msk.bf16.mxu1 %vm3498_vm1, %v3497_v29  ;;  %v3658_v49 = vshrl.u32 %v82_v44, 7 }
  0x15   :  { %56 = vadd.xlane.f32.xlu1 %v55_v5  ;;  %3053 = vmatpush3.bf16.msra.mxu1 %v3325_v28  ;;  %v3326_v30 = vld [vmem:[%s4161_s3] sm:$0xff]   ;;  %v3328_v32 = vld [vmem:[%s4161_s3 + $0x8] sm:$0xff]   ;;  %v3331_v35 = vld [vmem:[%s4162_s4 + $0x18] sm:$0xff]   ;;  %vm301_vm2 = vcmask 64512   ;;  %s3500_s27 = smov 120   ;;  %vm425_vm3 = vcmask 1043456  }
  0x16   :  { %3054 = vmatprep.subr.bf16.mxu1 %v3497_v29  ;;  %3041 = vmatpush3.bf16.msra.mxu0 %v3326_v30  ;;  %v3332_v36 = vld [vmem:[%s4161_s3 + $0x18] sm:$0xff]   ;;  %v84_v51 = vsub.s32 0, %v3658_v49  ;;  %v53_v52 = vld [vmem:[#allocation2] sm:$0xff]  ;;  %v90_v56 = vsub.s32 1, %v3658_v49  ;;  %s3501_s28 = smov 56   ;;  %s3502_s29 = smov 112  }
  0x17   :  { %3042 = vmatprep.subr.bf16.mxu0 %v3497_v29  ;;  %3048 = vmatprep.mubr.msk.bf16.mxu0 %vm3498_vm1, %v3497_v29  ;;  %s3503_s12 = smov 48   ;;  %s3504_s13 = smov 104  }
  0x18   :  { %98 = vadd.xlane.f32.xlu0 %v97_v4  ;;  %v85_v55 = vrot.slane %v53_v52, %v84_v51  ;;  %v91_v61 = vrot.slane %v53_v52, %v90_v56  ;;  %s3505_s16 = smov 40   ;;  %s3506_s17 = smov 96  }
  0x19   :  { %59 = vadd.xlane.f32.xlu1 %v58_v7  ;;  %3055 = vmatpush3.bf16.msra.mxu1 %v3327_v31  ;;  %s3507_s20 = smov 32   ;;  %s3508_s21 = smov 88  }
  0x1a   :  { %3056 = vmatprep.subr.bf16.mxu1 %v3497_v29  ;;  %3043 = vmatpush3.bf16.msra.mxu0 %v3328_v32  ;;  %s3509_s24 = smov 24   ;;  %s3510_s25 = smov 80  }
  0x1b   :  { %3044 = vmatprep.subr.bf16.mxu0 %v3497_v29  ;;  %s3511_s4 = smov 16  }
  0x1d   :  { %3057 = vmatpush3.bf16.msra.mxu1 %v3329_v33 }
  0x1e   :  { %3058 = vmatprep.subr.bf16.mxu1 %v3497_v29  ;;  %3045 = vmatpush3.bf16.msra.mxu0 %v3330_v34 }
  0x1f   :  { %3046 = vmatprep.subr.bf16.mxu0 %v3497_v29 }
  0x21   :  { %3059 = vmatpush3.bf16.msra.mxu1 %v3331_v35 }
  0x22   :  { %3082 = vmatprep.subr.bf16.mxu1 %v3497_v29  ;;  %3047 = vmatpush3.bf16.msra.mxu0 %v3332_v36 }
  0x23   :  { %3064 = vmatprep.subr.bf16.mxu0 %v3497_v29 }
  0xa1   :  { %v96_v8 = vpop.xlane.xlu0 %95 }
  0xa2   :  { %v57_v9 = vpop.xlane.xlu1 %56  ;;  %v100_v10 = vmul.f32 0.015625, %v96_v8 }
  0xa3   :  { %v62_v11 = vmul.f32 0.015625, %v57_v9 }
  0xa4   :  { %v3600_v12 = vsub.f32 %v51_v0, %v100_v10  ;;  %v2849_v10 = vld [vmem:[%s4163_s5] ss:$0 sm:$0xff]  ;;  %s3499_s5 = smov 64  }
  0xa5   :  { %v3602_v13 = vsub.f32 %v49_v2, %v62_v11  ;;  %v99_v14 = vpop.xlane.xlu0 %98  ;;  %v135_v11 = vsub.s32 2, %v3658_v49 }
  0xa6   :  { %v60_v15 = vpop.xlane.xlu1 %59  ;;  %v101_v16 = vmul.f32 0.015625, %v99_v14  ;;  %v104_v17 = vmul.f32 %v3600_v12, %v3600_v12 }
  0xa7   :  { %v63_v18 = vmul.f32 0.015625, %v60_v15  ;;  %v66_v19 = vmul.f32 %v3602_v13, %v3602_v13 }
  0xa8   :  { %v3608_v20 = vsub.f32 %v52_v1, %v101_v16  ;;  %v106_v21 = vsel %vm54_vm0, %v104_v17, 0.0 }
  0xa9   :  { %v3611_v22 = vsub.f32 %v50_v6, %v63_v18  ;;  %107 = vadd.xlane.f32.xlu0 %v106_v21  ;;  %v68_v24 = vsel %vm54_vm0, %v66_v19, 0.0  ;;  %v136_v18 = vrot.slane %v53_v52, %v135_v11 }
  0xaa   :  { %v105_v23 = vmul.f32 %v3608_v20, %v3608_v20 }
  0xab   :  { %v67_v25 = vmul.f32 %v3611_v22, %v3611_v22 }
  0xac   :  { %v109_v26 = vsel %vm54_vm0, %v105_v23, 0.0 }
  0xad   :  { %110 = vadd.xlane.f32.xlu1 %v109_v26  ;;  %69 = vadd.xlane.f32.xlu0 %v68_v24  ;;  %v71_v27 = vsel %vm54_vm0, %v67_v25, 0.0 }
  0xb1   :  { %72 = vadd.xlane.f32.xlu1 %v71_v27 }
 0x136   :  { %v108_v37 = vpop.xlane.xlu0 %107 }
 0x137   :  { %v112_v38 = vmul.f32 0.015625, %v108_v37 }
 0x139   :  { %v114_v39 = vadd.f32 1e-05, %v112_v38 }
 0x13a   :  { %v70_v40 = vpop.xlane.xlu0 %69  ;;  %v111_v41 = vpop.xlane.xlu1 %110 }
 0x13b   :  { %3361 = vrsqrt.f32 %v114_v39  ;;  %v74_v42 = vmul.f32 0.015625, %v70_v40  ;;  %v113_v43 = vmul.f32 0.015625, %v111_v41 }
 0x13d   :  { %v76_v45 = vadd.f32 1e-05, %v74_v42  ;;  %v115_v46 = vadd.f32 1e-05, %v113_v43 }
 0x13e   :  { %v73_v47 = vpop.xlane.xlu1 %72 }
 0x13f   :  { %3363 = vrsqrt.f32 %v76_v45  ;;  %v75_v48 = vmul.f32 0.015625, %v73_v47 }
 0x140   :  { %3365 = vrsqrt.f32 %v115_v46 }
 0x141   :  { %v77_v50 = vadd.f32 1e-05, %v75_v48 }
 0x143   :  { %3367 = vrsqrt.f32 %v77_v50 }
 0x145   :  { %v3362_v53 = vpop.eup %3361 }
 0x146   :  { %v118_v54 = vmul.f32 %v3362_v53, %v3600_v12 }
 0x148   :  { %v120_v62 = vmul.f32 %v118_v54, %v85_v55 }
 0x149   :  { %v3364_v57 = vpop.eup %3363 }
 0x14a   :  { %v3366_v58 = vpop.eup %3365  ;;  %v80_v59 = vmul.f32 %v3364_v57, %v3602_v13  ;;  %v122_v3 = vadd.f32 %v120_v62, %v91_v61 }
 0x14b   :  { %v119_v60 = vmul.f32 %v3366_v58, %v3608_v20 }
 0x14c   :  { %v86_v2 = vmul.f32 %v85_v55, %v80_v59 }
 0x14d   :  { %v3368_v63 = vpop.eup %3367  ;;  %v121_v0 = vmul.f32 %v119_v60, %v85_v55 }
 0x14e   :  { %v81_v1 = vmul.f32 %v3368_v63, %v3611_v22  ;;  %v92_v7 = vadd.f32 %v91_v61, %v86_v2 }
 0x14f   :  { %v123_v4 = vadd.f32 %v121_v0, %v91_v61 }
 0x150   :  { %v87_v5 = vmul.f32 %v85_v55, %v81_v1 }
 0x151   :  { %v205_v6 = vpack.c.bf16 %v123_v4, %v122_v3 }
 0x152   :  { %v93_v8 = vadd.f32 %v91_v61, %v87_v5 }
 0x153   :  { %3061 = vmatmul.mubr.msk.bf16.vlgmr.msra.gmra.mrb[0].mxu1 %vm54_vm0, %v205_v6 }
 0x154   :  { %v124_v9 = vpack.c.bf16 %v93_v8, %v92_v7  ;;  %3084 = vmatprep.mubr.msk.bf16.mxu1 %vm3498_vm1, %v3497_v29 }
 0x156   :  { %3049 = vmatmul.mubr.msk.bf16.vlgmr.msra.gmra.mrb[0].mxu0 %vm54_vm0, %v124_v9 }
 0x157   :  { %3066 = vmatprep.mubr.msk.bf16.mxu0 %vm3498_vm1, %v3497_v29 }
 0x226   :  { %v282_v12 = vpop.f32.mrb[0].mxu1 }
 0x227   :  { %v283_v13 = vadd.f32 %v2849_v10, %v282_v12  ;;  %v3062_v14 = vpop.f32.mrb[1].mxu1 }
 0x228   :  { %v285_v15 = vpop.f32.mrb[2].mxu1 }
 0x229   :  { %v3680_v16 = vpack.c.bf16 %v283_v13, %v283_v13  ;;  %v3063_v17 = vpop.f32.mrb[3].mxu1  ;;  %v198_v19 = vpop.f32.mrb[0].mxu0  ;;  %v286_v21 = vadd.f32 %v2849_v10, %v285_v15 }
 0x22a   :  { %v3050_v20 = vpop.f32.mrb[1].mxu0  ;;  %v199_v25 = vadd.f32 %v198_v19, %v136_v18 }
 0x22b   :  { %v201_v22 = vpop.f32.mrb[2].mxu0  ;;  %v306_v23 = vsel %vm301_vm2, %v3680_v16, 0  ;;  %v3685_v26 = vpack.c.bf16 %v286_v21, %v286_v21 }
 0x22c   :  { %3065 = vmatpush3.bf16.xpose.msra.mxu0 %v306_v23  ;;  %v3051_v24 = vpop.f32.mrb[3].mxu0  ;;  %v3687_v27 = vpack.c.bf16 %v199_v25, %v199_v25  ;;  %v202_v30 = vadd.f32 %v201_v22, %v136_v18 }
 0x22d   :  { %3070 = vmatprep.subr.bf16.mxu0 %v3497_v29  ;;  %v352_v28 = vsel %vm301_vm2, %v3685_v26, 0 }
 0x22e   :  { %v3696_v31 = vpack.c.bf16 %v202_v30, %v202_v30 }
 0x233   :  { %3067 = vmatmul.mubr.msk.bf16.vlgmr.msra.gmra.mrb[4].mxu0 %vm301_vm2, %v3687_v27 }
 0x234   :  { %3071 = vmatpush3.bf16.xpose.msra.mxu0 %v352_v28  ;;  %3072 = vmatprep.mubr.msk.bf16.mxu0 %vm3498_vm1, %v3497_v29 }
 0x235   :  { %3076 = vmatprep.subr.bf16.mxu0 %v3497_v29 }
 0x23b   :  { %3073 = vmatmul.mubr.msk.bf16.vlgmr.msra.gmra.mrb[8].mxu0 %vm301_vm2, %v3696_v31 }
 0x23c   :  { %3078 = vmatprep.mubr.msk.bf16.mxu0 %vm3498_vm1, %v3497_v29 }
 0x306   :  { %v342_v32 = vpop.f32.mrb[4].mxu0 }
 0x307   :  { %v394_v33 = vmul.f32 0.35355338, %v342_v32  ;;  %v3068_v34 = vpop.f32.mrb[5].mxu0 }
 0x308   :  { %v345_v35 = vpop.f32.mrb[6].mxu0 }
 0x309   :  { %v3069_v36 = vpop.f32.mrb[7].mxu0  ;;  %v396_v37 = vsel %vm301_vm2, %v394_v33, -inf }
 0x30a   :  { %397 = vmax.xlane.f32.xlu0 %v396_v37 }
 0x30e   :  { %v388_v38 = vpop.f32.mrb[8].mxu0 }
 0x30f   :  { %v395_v39 = vmul.f32 0.35355338, %v388_v38  ;;  %v3074_v40 = vpop.f32.mrb[9].mxu0 }
 0x310   :  { %v391_v41 = vpop.f32.mrb[10].mxu0 }
 0x311   :  { %v3075_v42 = vpop.f32.mrb[11].mxu0  ;;  %v399_v43 = vsel %vm301_vm2, %v395_v39, -inf }
 0x312   :  { %400 = vmax.xlane.f32.xlu1 %v399_v43 }
 0x323   :  { %469 = vrot.lane.b32.xlu1 %v3685_v26, %s3499_s5 }
 0x327   :  { %521 = vrot.lane.b32.xlu1 %v3680_v16, %s3500_s27 }
 0x397   :  { %v398_v44 = vpop.xlane.xlu0 %397 }
 0x398   :  { %v402_v45 = vsub.f32 %v394_v33, %v398_v44 }
 0x39a   :  { %v404_v46 = vmul.f32 1.442695, %v402_v45 }
 0x39c   :  { %3369 = vpow2.f32 %v404_v46 }
 0x39f   :  { %v401_v47 = vpop.xlane.xlu1 %400 }
 0x3a0   :  { %v403_v48 = vsub.f32 %v395_v39, %v401_v47 }
 0x3a2   :  { %v406_v50 = vmul.f32 1.442695, %v403_v48 }
 0x3a3   :  { %v470_v52 = vpop.permute.xlu1 %469 }
 0x3a4   :  { %3371 = vpow2.f32 %v406_v50  ;;  %v475_v53 = vsel %vm425_vm3, %v470_v52, 0 }
 0x3a5   :  { %3083 = vmatpush3.bf16.msra.mxu1 %v475_v53 }
 0x3a6   :  { %v3370_v54 = vpop.eup %3369  ;;  %3094 = vmatprep.subr.bf16.mxu1 %v3497_v29 }
 0x3a7   :  { %v408_v55 = vsel %vm301_vm2, %v3370_v54, 0.0  ;;  %v522_v60 = vpop.permute.xlu1 %521 }
 0x3a8   :  { %409 = vadd.xlane.f32.xlu0 %v408_v55  ;;  %v527_v3 = vsel %vm301_vm2, %v522_v60, 0  ;;  %v518_v60 = vld [vmem:[%s4164_s6] sm:$0xf] }
 0x3ae   :  { %v3372_v57 = vpop.eup %3371 }
 0x3af   :  { %v411_v58 = vsel %vm301_vm2, %v3372_v57, 0.0 }
 0x3b0   :  { %412 = vadd.xlane.f32.xlu1 %v411_v58 }
 0x3be   :  { %420 = vrot.lane.b32.xlu0 %v3680_v16, %s3499_s5  ;;  %s3512_s5 = smov 72  }
 0x3c1   :  { %571 = vrot.lane.b32.xlu1 %v3685_v26, %s3500_s27 }
 0x3c2   :  { %519 = vrot.lane.b32.xlu0 %v3687_v27, %s3500_s27 }
 0x3c5   :  { %569 = vrot.lane.b32.xlu1 %v3696_v31, %s3500_s27 }
 0x435   :  { %v410_v59 = vpop.xlane.xlu0 %409 }
 0x436   :  { %3373 = vrcp.f32 %v410_v59 }
 0x439   :  { %v421_v61 = vpop.permute.xlu0 %420 }
 0x43a   :  { %v427_v62 = vsel %vm425_vm3, %v421_v61, 0 }
 0x43b   :  { %3077 = vmatpush3.bf16.msra.mxu0 %v427_v62 }
 0x43c   :  { %3088 = vmatprep.subr.bf16.mxu0 %v3497_v29 }
 0x43d   :  { %v413_v63 = vpop.xlane.xlu1 %412  ;;  %v520_v8 = vpop.permute.xlu0 %519 }
 0x43e   :  { %3375 = vrcp.f32 %v413_v63  ;;  %v794_v63 = vsel %vm425_vm3, %v518_v60, 0 }
 0x440   :  { %v3374_v0 = vpop.eup %3373 }
 0x441   :  { %v416_v1 = vmul.f32 %v3374_v0, %v3370_v54  ;;  %v572_v6 = vpop.permute.xlu1 %571 }
 0x442   :  { %v577_v9 = vsel %vm301_vm2, %v572_v6, 0 }
 0x443   :  { %v418_v2 = vpack.c.bf16 %v416_v1, %v416_v1 }
 0x445   :  { %3079 = vmatmul.mubr.msk.bf16.vlgmr.msra.gmra.mrb[12].mxu0 %vm301_vm2, %v418_v2  ;;  %v570_v10 = vpop.permute.xlu1 %569 }
 0x446   :  { %3089 = vmatpush3.bf16.xpose.msra.mxu0 %v527_v3  ;;  %3090 = vmatprep.mubr.msk.bf16.mxu0 %vm3498_vm1, %v3497_v29 }
 0x447   :  { %3100 = vmatprep.subr.bf16.mxu0 %v3497_v29 }
 0x448   :  { %v3376_v4 = vpop.eup %3375 }
 0x449   :  { %v417_v5 = vmul.f32 %v3376_v4, %v3372_v57  ;;  %v742_v4 = vld [vmem:[%s4164_s6 + $0x4] sm:$0xf] }
 0x44b   :  { %v419_v7 = vpack.c.bf16 %v417_v5, %v417_v5  ;;  %v747_v5 = vsel %vm425_vm3, %v742_v4, 0 }
 0x44d   :  { %3085 = vmatmul.mubr.msk.bf16.vlgmr.msra.gmra.mrb[4].mxu1 %vm301_vm2, %v419_v7  ;;  %3091 = vmatmul.mubr.msk.bf16.vlgmr.msra.gmra.mrb[16].mxu0 %vm301_vm2, %v520_v8 }
 0x44e   :  { %3095 = vmatpush3.bf16.xpose.msra.mxu1 %v577_v9  ;;  %3096 = vmatprep.mubr.msk.bf16.mxu1 %vm3498_vm1, %v3497_v29 }
 0x44f   :  { %3106 = vmatprep.subr.bf16.mxu1 %v3497_v29  ;;  %3102 = vmatprep.mubr.msk.bf16.mxu0 %vm3498_vm1, %v3497_v29 }
 0x455   :  { %3097 = vmatmul.mubr.msk.bf16.vlgmr.msra.gmra.mrb[8].mxu1 %vm301_vm2, %v570_v10 }
 0x456   :  { %3108 = vmatprep.mubr.msk.bf16.mxu1 %vm3498_vm1, %v3497_v29 }
 0x518   :  { %v3732_v11 = vpop.f32.mrb[12].mxu0 }
 0x519   :  { %v3080_v12 = vpop.f32.mrb[13].mxu0 }
 0x51a   :  { %v466_v13 = vpop.f32.mrb[14].mxu0 }
 0x51b   :  { %v3081_v14 = vpop.f32.mrb[15].mxu0 }
 0x520   :  { %v3734_v15 = vpop.f32.mrb[4].mxu1  ;;  %v563_v17 = vpop.f32.mrb[16].mxu0 }
 0x521   :  { %v517_v18 = vpack.c.bf16 %v3734_v15, %v3732_v11  ;;  %v619_v19 = vmul.f32 0.35355338, %v563_v17  ;;  %v3086_v20 = vpop.f32.mrb[5].mxu1  ;;  %v3092_v21 = vpop.f32.mrb[17].mxu0 }
 0x522   :  { %v514_v22 = vpop.f32.mrb[6].mxu1  ;;  %v566_v23 = vpop.f32.mrb[18].mxu0 }
 0x523   :  { %v3087_v24 = vpop.f32.mrb[7].mxu1  ;;  %v3093_v25 = vpop.f32.mrb[19].mxu0  ;;  %v621_v28 = vsel %vm301_vm2, %v619_v19, -inf }
 0x524   :  { %622 = vmax.xlane.f32.xlu0 %v621_v28 }
 0x528   :  { %v613_v30 = vpop.f32.mrb[8].mxu1 }
 0x529   :  { %v620_v32 = vmul.f32 0.35355338, %v613_v30  ;;  %v3098_v33 = vpop.f32.mrb[9].mxu1 }
 0x52a   :  { %v616_v34 = vpop.f32.mrb[10].mxu1 }
 0x52b   :  { %v3099_v35 = vpop.f32.mrb[11].mxu1  ;;  %v624_v36 = vsel %vm301_vm2, %v620_v32, -inf }
 0x52c   :  { %625 = vmax.xlane.f32.xlu1 %v624_v36 }
 0x53d   :  { %693 = vrot.lane.b32.xlu1 %v3685_v26, %s3501_s28 }
 0x541   :  { %839 = vrot.lane.b32.xlu1 %v3680_v16, %s3502_s29 }
 0x545   :  { %889 = vrot.lane.b32.xlu1 %v3685_v26, %s3502_s29 }
 0x549   :  { %887 = vrot.lane.b32.xlu1 %v3696_v31, %s3502_s29 }
 0x5b1   :  { %v623_v37 = vpop.xlane.xlu0 %622 }
 0x5b2   :  { %v627_v38 = vsub.f32 %v619_v19, %v623_v37 }
 0x5b4   :  { %v629_v39 = vmul.f32 1.442695, %v627_v38 }
 0x5b6   :  { %3377 = vpow2.f32 %v629_v39 }
 0x5b9   :  { %v626_v40 = vpop.xlane.xlu1 %625 }
 0x5ba   :  { %v628_v41 = vsub.f32 %v620_v32, %v626_v40 }
 0x5bc   :  { %v631_v42 = vmul.f32 1.442695, %v628_v41 }
 0x5bd   :  { %v694_v43 = vpop.permute.xlu1 %693 }
 0x5be   :  { %3379 = vpow2.f32 %v631_v42  ;;  %v699_v44 = vsel %vm425_vm3, %v694_v43, 0 }
 0x5bf   :  { %3107 = vmatpush3.bf16.msra.mxu1 %v699_v44 }
 0x5c0   :  { %v3378_v45 = vpop.eup %3377  ;;  %3118 = vmatprep.subr.bf16.mxu1 %v3497_v29 }
 0x5c1   :  { %v633_v46 = vsel %vm301_vm2, %v3378_v45, 0.0  ;;  %v840_v0 = vpop.permute.xlu1 %839 }
 0x5c2   :  { %634 = vadd.xlane.f32.xlu0 %v633_v46  ;;  %v845_v14 = vsel %vm301_vm2, %v840_v0, 0 }
 0x5c5   :  { %v890_v1 = vpop.permute.xlu1 %889 }
 0x5c6   :  { %v895_v2 = vsel %vm301_vm2, %v890_v1, 0 }
 0x5c8   :  { %v3380_v47 = vpop.eup %3379 }
 0x5c9   :  { %v636_v48 = vsel %vm301_vm2, %v3380_v47, 0.0  ;;  %v888_v3 = vpop.permute.xlu1 %887 }
 0x5ca   :  { %637 = vadd.xlane.f32.xlu0 %v636_v48 }
 0x5e0   :  { %645 = vrot.lane.b32.xlu0 %v3680_v16, %s3501_s28 }
 0x5e4   :  { %837 = vrot.lane.b32.xlu0 %v3687_v27, %s3502_s29  ;;  %s3513_s29 = smov 8  }
 0x64f   :  { %v635_v50 = vpop.xlane.xlu0 %634 }
 0x650   :  { %3381 = vrcp.f32 %v635_v50 }
 0x657   :  { %v638_v52 = vpop.xlane.xlu0 %637 }
 0x658   :  { %3383 = vrcp.f32 %v638_v52 }
 0x65a   :  { %v3382_v53 = vpop.eup %3381 }
 0x65b   :  { %v641_v54 = vmul.f32 %v3382_v53, %v3378_v45  ;;  %v646_v55 = vpop.permute.xlu0 %645 }
 0x65c   :  { %v651_v57 = vsel %vm425_vm3, %v646_v55, 0 }
 0x65d   :  { %3101 = vmatpush3.bf16.msra.mxu0 %v651_v57  ;;  %v643_v58 = vpack.c.bf16 %v641_v54, %v641_v54 }
 0x65e   :  { %3112 = vmatprep.subr.bf16.mxu0 %v3497_v29 }
 0x65f   :  { %v838_v19 = vpop.permute.xlu0 %837 }
 0x660   :  { %3103 = vmatmul.mubr.msk.bf16.vlgmr.msra.gmra.mrb[20].mxu0 %vm301_vm2, %v643_v58 }
 0x661   :  { %3114 = vmatprep.mubr.msk.bf16.mxu0 %vm3498_vm1, %v3497_v29  ;;  %3113 = vmatpush3.bf16.msra.mxu0 %v747_v5 }
 0x662   :  { %v3384_v59 = vpop.eup %3383  ;;  %3124 = vmatprep.subr.bf16.mxu0 %v3497_v29 }
 0x663   :  { %v642_v61 = vmul.f32 %v3384_v59, %v3380_v47 }
 0x665   :  { %v644_v62 = vpack.c.bf16 %v642_v61, %v642_v61 }
 0x667   :  { %3109 = vmatmul.mubr.msk.bf16.vlgmr.msra.gmra.mrb[12].mxu1 %vm301_vm2, %v644_v62 }
 0x668   :  { %3119 = vmatpush3.bf16.msra.mxu1 %v794_v63  ;;  %3120 = vmatprep.mubr.msk.bf16.mxu1 %vm3498_vm1, %v3497_v29 }
 0x669   :  { %3130 = vmatprep.subr.bf16.mxu1 %v3497_v29 }
 0x66f   :  { %3121 = vmatmul.mubr.msk.bf16.vlgmr.msra.gmra.mrb[16].mxu1 %vm301_vm2, %v517_v18 }
 0x670   :  { %3132 = vmatprep.mubr.msk.bf16.mxu1 %vm3498_vm1, %v3497_v29 }
 0x671   :  { %3131 = vmatpush3.bf16.xpose.msra.mxu1 %v895_v2 }
 0x672   :  { %3142 = vmatprep.subr.bf16.mxu1 %v3497_v29 }
 0x678   :  { %3133 = vmatmul.mubr.msk.bf16.vlgmr.msra.gmra.mrb[20].mxu1 %vm301_vm2, %v888_v3 }
 0x679   :  { %3144 = vmatprep.mubr.msk.bf16.mxu1 %vm3498_vm1, %v3497_v29 }
 0x733   :  { %v687_v6 = vpop.f32.mrb[20].mxu0 }
 0x734   :  { %v3104_v7 = vpop.f32.mrb[21].mxu0 }
 0x735   :  { %v690_v8 = vpop.f32.mrb[22].mxu0 }
 0x736   :  { %v3105_v9 = vpop.f32.mrb[23].mxu0 }
 0x73a   :  { %v735_v10 = vpop.f32.mrb[12].mxu1 }
 0x73b   :  { %v741_v11 = vpack.c.bf16 %v735_v10, %v687_v6  ;;  %v3110_v12 = vpop.f32.mrb[13].mxu1 }
 0x73c   :  { %v738_v13 = vpop.f32.mrb[14].mxu1  ;;  %v1060_v12 = vld [vmem:[%s4164_s6 + $0x8] sm:$0xf] }
 0x73d   :  { %v3111_v15 = vpop.f32.mrb[15].mxu1  ;;  %3115 = vmatmul.mubr.msk.bf16.vlgmr.msra.gmra.mrb[24].mxu0 %vm301_vm2, %v741_v11  ;;  %v1065_v13 = vsel %vm425_vm3, %v1060_v12, 0 }
 0x73e   :  { %3125 = vmatpush3.bf16.xpose.msra.mxu0 %v845_v14  ;;  %3126 = vmatprep.mubr.msk.bf16.mxu0 %vm3498_vm1, %v3497_v29 }
 0x73f   :  { %3136 = vmatprep.subr.bf16.mxu0 %v3497_v29 }
 0x742   :  { %v830_v17 = vpop.f32.mrb[16].mxu1 }
 0x743   :  { %v3122_v18 = vpop.f32.mrb[17].mxu1 }
 0x744   :  { %v833_v20 = vpop.f32.mrb[18].mxu1 }
 0x745   :  { %v3123_v21 = vpop.f32.mrb[19].mxu1  ;;  %3127 = vmatmul.mubr.msk.bf16.vlgmr.msra.gmra.mrb[28].mxu0 %vm301_vm2, %v838_v19 }
 0x746   :  { %3138 = vmatprep.mubr.msk.bf16.mxu0 %vm3498_vm1, %v3497_v29 }
 0x74b   :  { %v931_v22 = vpop.f32.mrb[20].mxu1 }
 0x74c   :  { %v938_v23 = vmul.f32 0.35355338, %v931_v22  ;;  %v3134_v24 = vpop.f32.mrb[21].mxu1 }
 0x74d   :  { %v934_v25 = vpop.f32.mrb[22].mxu1 }
 0x74e   :  { %v3135_v28 = vpop.f32.mrb[23].mxu1  ;;  %v942_v30 = vsel %vm301_vm2, %v938_v23, -inf }
 0x74f   :  { %943 = vmax.xlane.f32.xlu1 %v942_v30 }
 0x760   :  { %1011 = vrot.lane.b32.xlu1 %v3685_v26, %s3503_s12 }
 0x764   :  { %1112 = vrot.lane.b32.xlu1 %v3680_v16, %s3504_s13 }
 0x768   :  { %1162 = vrot.lane.b32.xlu1 %v3685_v26, %s3504_s13 }
 0x76c   :  { %1160 = vrot.lane.b32.xlu1 %v3696_v31, %s3504_s13 }
 0x7dc   :  { %v944_v32 = vpop.xlane.xlu1 %943 }
 0x7dd   :  { %v946_v35 = vsub.f32 %v938_v23, %v944_v32 }
 0x7df   :  { %v949_v36 = vmul.f32 1.442695, %v946_v35 }
 0x7e0   :  { %v1012_v33 = vpop.permute.xlu1 %1011 }
 0x7e1   :  { %v1017_v34 = vsel %vm425_vm3, %v1012_v33, 0  ;;  %3385 = vpow2.f32 %v949_v36 }
 0x7e2   :  { %3143 = vmatpush3.bf16.msra.mxu1 %v1017_v34 }
 0x7e3   :  { %3154 = vmatprep.subr.bf16.mxu1 %v3497_v29 }
 0x7e4   :  { %v1113_v62 = vpop.permute.xlu1 %1112 }
 0x7e5   :  { %v1118_v0 = vsel %vm301_vm2, %v1113_v62, 0 }
 0x7e8   :  { %v1163_v21 = vpop.permute.xlu1 %1162 }
 0x7e9   :  { %v1168_v28 = vsel %vm301_vm2, %v1163_v21, 0 }
 0x7eb   :  { %v3386_v50 = vpop.eup %3385 }
 0x7ec   :  { %v954_v52 = vsel %vm301_vm2, %v3386_v50, 0.0  ;;  %v1161_v32 = vpop.permute.xlu1 %1160 }
 0x810   :  { %v783_v37 = vpop.f32.mrb[24].mxu0 }
 0x811   :  { %v3798_v38 = vadd.f32 %v830_v17, %v783_v37  ;;  %v3116_v39 = vpop.f32.mrb[25].mxu0 }
 0x812   :  { %v786_v40 = vpop.f32.mrb[26].mxu0 }
 0x813   :  { %v3800_v41 = vadd.f32 %v833_v20, %v786_v40  ;;  %v3117_v42 = vpop.f32.mrb[27].mxu0 }
 0x818   :  { %v881_v43 = vpop.f32.mrb[28].mxu0 }
 0x819   :  { %v937_v44 = vmul.f32 0.35355338, %v881_v43  ;;  %v3128_v45 = vpop.f32.mrb[29].mxu0 }
 0x81a   :  { %v884_v46 = vpop.f32.mrb[30].mxu0 }
 0x81b   :  { %v3129_v47 = vpop.f32.mrb[31].mxu0  ;;  %v939_v48 = vsel %vm301_vm2, %v937_v44, -inf }
 0x81c   :  { %940 = vmax.xlane.f32.xlu0 %v939_v48 }
 0x820   :  { %955 = vadd.xlane.f32.xlu0 %v954_v52 }
 0x8a9   :  { %v941_v53 = vpop.xlane.xlu0 %940 }
 0x8aa   :  { %v945_v54 = vsub.f32 %v937_v44, %v941_v53 }
 0x8ac   :  { %v947_v55 = vmul.f32 1.442695, %v945_v54 }
 0x8ad   :  { %v956_v57 = vpop.xlane.xlu0 %955 }
 0x8ae   :  { %3387 = vpow2.f32 %v947_v55 }
 0x8af   :  { %3389 = vrcp.f32 %v956_v57 }
 0x8b8   :  { %v3388_v58 = vpop.eup %3387 }
 0x8b9   :  { %v3390_v59 = vpop.eup %3389  ;;  %v951_v60 = vsel %vm301_vm2, %v3388_v58, 0.0 }
 0x8ba   :  { %v960_v61 = vmul.f32 %v3390_v59, %v3386_v50  ;;  %952 = vadd.xlane.f32.xlu0 %v951_v60 }
 0x8bc   :  { %v962_v63 = vpack.c.bf16 %v960_v61, %v960_v61 }
 0x8be   :  { %3145 = vmatmul.mubr.msk.bf16.vlgmr.msra.gmra.mrb[24].mxu1 %vm301_vm2, %v962_v63 }
 0x8bf   :  { %3155 = vmatpush3.bf16.xpose.msra.mxu1 %v1118_v0  ;;  %3156 = vmatprep.mubr.msk.bf16.mxu1 %vm3498_vm1, %v3497_v29 }
 0x8c0   :  { %3166 = vmatprep.subr.bf16.mxu1 %v3497_v29 }
 0x8d0   :  { %963 = vrot.lane.b32.xlu0 %v3680_v16, %s3503_s12 }
 0x8d4   :  { %1110 = vrot.lane.b32.xlu0 %v3687_v27, %s3504_s13 }
 0x947   :  { %v953_v1 = vpop.xlane.xlu0 %952 }
 0x948   :  { %3391 = vrcp.f32 %v953_v1 }
 0x94b   :  { %v964_v2 = vpop.permute.xlu0 %963 }
 0x94c   :  { %v969_v3 = vsel %vm425_vm3, %v964_v2, 0 }
 0x94d   :  { %3137 = vmatpush3.bf16.msra.mxu0 %v969_v3 }
 0x94e   :  { %3148 = vmatprep.subr.bf16.mxu0 %v3497_v29 }
 0x94f   :  { %v1111_v4 = vpop.permute.xlu0 %1110 }
 0x950   :  { %3157 = vmatmul.mubr.msk.bf16.vlgmr.msra.gmra.mrb[28].mxu1 %vm301_vm2, %v1111_v4 }
 0x951   :  { %3168 = vmatprep.mubr.msk.bf16.mxu1 %vm3498_vm1, %v3497_v29 }
 0x952   :  { %v3392_v5 = vpop.eup %3391 }
 0x953   :  { %v959_v6 = vmul.f32 %v3392_v5, %v3388_v58 }
 0x955   :  { %v961_v7 = vpack.c.bf16 %v959_v6, %v959_v6 }
 0x957   :  { %3139 = vmatmul.mubr.msk.bf16.vlgmr.msra.gmra.mrb[32].mxu0 %vm301_vm2, %v961_v7 }
 0x958   :  { %3150 = vmatprep.mubr.msk.bf16.mxu0 %vm3498_vm1, %v3497_v29  ;;  %3149 = vmatpush3.bf16.msra.mxu0 %v1065_v13 }
 0x959   :  { %3160 = vmatprep.subr.bf16.mxu0 %v3497_v29 }
 0x991   :  { %v1053_v8 = vpop.f32.mrb[24].mxu1 }
 0x992   :  { %v3146_v9 = vpop.f32.mrb[25].mxu1 }
 0x993   :  { %v1056_v10 = vpop.f32.mrb[26].mxu1  ;;  %v1333_v9 = vld [vmem:[%s4164_s6 + $0xc] sm:$0xf] }
 0x994   :  { %v3147_v11 = vpop.f32.mrb[27].mxu1  ;;  %v1338_v10 = vsel %vm425_vm3, %v1333_v9, 0 }
 0xa23   :  { %v1154_v14 = vpop.f32.mrb[28].mxu1 }
 0xa24   :  { %v1210_v15 = vmul.f32 0.35355338, %v1154_v14  ;;  %v3158_v17 = vpop.f32.mrb[29].mxu1 }
 0xa25   :  { %v1157_v18 = vpop.f32.mrb[30].mxu1 }
 0xa26   :  { %v3159_v19 = vpop.f32.mrb[31].mxu1  ;;  %v1212_v20 = vsel %vm301_vm2, %v1210_v15, -inf }
 0xa27   :  { %1213 = vmax.xlane.f32.xlu0 %v1212_v20 }
 0xa2a   :  { %v1005_v22 = vpop.f32.mrb[32].mxu0 }
 0xa2b   :  { %v1059_v23 = vpack.c.bf16 %v1053_v8, %v1005_v22  ;;  %v3140_v24 = vpop.f32.mrb[33].mxu0 }
 0xa2c   :  { %v1008_v25 = vpop.f32.mrb[34].mxu0 }
 0xa2d   :  { %v3141_v30 = vpop.f32.mrb[35].mxu0  ;;  %3151 = vmatmul.mubr.msk.bf16.vlgmr.msra.gmra.mrb[36].mxu0 %vm301_vm2, %v1059_v23 }
 0xa2e   :  { %3161 = vmatpush3.bf16.xpose.msra.mxu0 %v1168_v28  ;;  %3162 = vmatprep.mubr.msk.bf16.mxu0 %vm3498_vm1, %v3497_v29 }
 0xa2f   :  { %3172 = vmatprep.subr.bf16.mxu0 %v3497_v29 }
 0xa35   :  { %3163 = vmatmul.mubr.msk.bf16.vlgmr.msra.gmra.mrb[40].mxu0 %vm301_vm2, %v1161_v32 }
 0xa36   :  { %3174 = vmatprep.mubr.msk.bf16.mxu0 %vm3498_vm1, %v3497_v29 }
 0xab4   :  { %v1214_v33 = vpop.xlane.xlu0 %1213 }
 0xab5   :  { %v1218_v34 = vsub.f32 %v1210_v15, %v1214_v33 }
 0xab7   :  { %v1220_v35 = vmul.f32 1.442695, %v1218_v34 }
 0xab9   :  { %3393 = vpow2.f32 %v1220_v35 }
 0xac3   :  { %v3394_v36 = vpop.eup %3393 }
 0xac4   :  { %v1224_v37 = vsel %vm301_vm2, %v3394_v36, 0.0 }
 0xac5   :  { %1225 = vadd.xlane.f32.xlu0 %v1224_v37 }
 0xb00   :  { %v1101_v39 = vpop.f32.mrb[36].mxu0 }
 0xb01   :  { %v3838_v40 = vadd.f32 %v1101_v39, %v3798_v38  ;;  %v3152_v42 = vpop.f32.mrb[37].mxu0 }
 0xb02   :  { %v1104_v43 = vpop.f32.mrb[38].mxu0 }
 0xb03   :  { %v3841_v44 = vadd.f32 %v1104_v43, %v3800_v41  ;;  %v3153_v45 = vpop.f32.mrb[39].mxu0 }
 0xb08   :  { %v1204_v46 = vpop.f32.mrb[40].mxu0 }
 0xb09   :  { %v1211_v47 = vmul.f32 0.35355338, %v1204_v46  ;;  %v3164_v48 = vpop.f32.mrb[41].mxu0 }
 0xb0a   :  { %v1207_v50 = vpop.f32.mrb[42].mxu0 }
 0xb0b   :  { %v3165_v52 = vpop.f32.mrb[43].mxu0  ;;  %v1215_v53 = vsel %vm301_vm2, %v1211_v47, -inf }
 0xb0c   :  { %1216 = vmax.xlane.f32.xlu1 %v1215_v53 }
 0xb1d   :  { %1284 = vrot.lane.b32.xlu1 %v3685_v26, %s3505_s16 }
 0xb21   :  { %1385 = vrot.lane.b32.xlu1 %v3680_v16, %s3506_s17 }
 0xb25   :  { %1435 = vrot.lane.b32.xlu1 %v3685_v26, %s3506_s17 }
 0xb29   :  { %1433 = vrot.lane.b32.xlu1 %v3696_v31, %s3506_s17 }
 0xb52   :  { %v1226_v60 = vpop.xlane.xlu0 %1225 }
 0xb99   :  { %v1217_v38 = vpop.xlane.xlu1 %1216 }
 0xb9a   :  { %v1219_v41 = vsub.f32 %v1211_v47, %v1217_v38 }
 0xb9c   :  { %v1222_v54 = vmul.f32 1.442695, %v1219_v41 }
 0xb9d   :  { %v1285_v55 = vpop.permute.xlu1 %1284 }
 0xb9e   :  { %3395 = vpow2.f32 %v1222_v54  ;;  %v1290_v57 = vsel %vm425_vm3, %v1285_v55, 0 }
 0xb9f   :  { %3173 = vmatpush3.bf16.msra.mxu0 %v1290_v57  ;;  %3397 = vrcp.f32 %v1226_v60 }
 0xba0   :  { %3184 = vmatprep.subr.bf16.mxu0 %v3497_v29 }
 0xba1   :  { %v1386_v5 = vpop.permute.xlu1 %1385 }
 0xba2   :  { %v1391_v7 = vsel %vm301_vm2, %v1386_v5, 0 }
 0xba5   :  { %v1436_v15 = vpop.permute.xlu1 %1435 }
 0xba6   :  { %v1441_v21 = vsel %vm301_vm2, %v1436_v15, 0 }
 0xba8   :  { %v3396_v58 = vpop.eup %3395 }
 0xba9   :  { %v1227_v59 = vsel %vm301_vm2, %v3396_v58, 0.0  ;;  %v3398_v61 = vpop.eup %3397  ;;  %v1434_v28 = vpop.permute.xlu1 %1433 }
 0xbaa   :  { %1228 = vadd.xlane.f32.xlu0 %v1227_v59  ;;  %v1232_v63 = vmul.f32 %v3398_v61, %v3394_v36 }
 0xbac   :  { %v1234_v2 = vpack.c.bf16 %v1232_v63, %v1232_v63 }
 0xbc0   :  { %1236 = vrot.lane.b32.xlu0 %v3680_v16, %s3505_s16 }
 0xbc4   :  { %1383 = vrot.lane.b32.xlu0 %v3687_v27, %s3506_s17 }
 0xc37   :  { %v1229_v62 = vpop.xlane.xlu0 %1228 }
 0xc38   :  { %3399 = vrcp.f32 %v1229_v62 }
 0xc3b   :  { %v1237_v0 = vpop.permute.xlu0 %1236 }
 0xc3c   :  { %v1242_v1 = vsel %vm425_vm3, %v1237_v0, 0 }
 0xc3d   :  { %3167 = vmatpush3.bf16.msra.mxu1 %v1242_v1 }
 0xc3e   :  { %3178 = vmatprep.subr.bf16.mxu1 %v3497_v29 }
 0xc3f   :  { %v1384_v8 = vpop.permute.xlu0 %1383 }
 0xc40   :  { %3169 = vmatmul.mubr.msk.bf16.vlgmr.msra.gmra.mrb[32].mxu1 %vm301_vm2, %v1234_v2 }
 0xc41   :  { %3180 = vmatprep.mubr.msk.bf16.mxu1 %vm3498_vm1, %v3497_v29  ;;  %3179 = vmatpush3.bf16.msra.mxu1 %v1338_v10  ;;  %v1606_v10 = vld [vmem:[%s4164_s6 + $0x10] sm:$0xf] }
 0xc42   :  { %v3400_v3 = vpop.eup %3399  ;;  %3190 = vmatprep.subr.bf16.mxu1 %v3497_v29 }
 0xc43   :  { %v1233_v4 = vmul.f32 %v3400_v3, %v3396_v58 }
 0xc45   :  { %v1235_v6 = vpack.c.bf16 %v1233_v4, %v1233_v4 }
 0xc47   :  { %3175 = vmatmul.mubr.msk.bf16.vlgmr.msra.gmra.mrb[44].mxu0 %vm301_vm2, %v1235_v6 }
 0xc48   :  { %3185 = vmatpush3.bf16.xpose.msra.mxu0 %v1391_v7  ;;  %3186 = vmatprep.mubr.msk.bf16.mxu0 %vm3498_vm1, %v3497_v29 }
 0xc49   :  { %3196 = vmatprep.subr.bf16.mxu0 %v3497_v29 }
 0xc4f   :  { %3187 = vmatmul.mubr.msk.bf16.vlgmr.msra.gmra.mrb[48].mxu0 %vm301_vm2, %v1384_v8 }
 0xc50   :  { %3198 = vmatprep.mubr.msk.bf16.mxu0 %vm3498_vm1, %v3497_v29 }
 0xd13   :  { %v1278_v11 = vpop.f32.mrb[32].mxu1 }
 0xd14   :  { %v3170_v12 = vpop.f32.mrb[33].mxu1 }
 0xd15   :  { %v1281_v13 = vpop.f32.mrb[34].mxu1 }
 0xd16   :  { %v3171_v14 = vpop.f32.mrb[35].mxu1 }
 0xd1a   :  { %v1326_v17 = vpop.f32.mrb[44].mxu0 }
 0xd1b   :  { %v1332_v18 = vpack.c.bf16 %v1326_v17, %v1278_v11  ;;  %v3176_v19 = vpop.f32.mrb[45].mxu0  ;;  %v1611_v11 = vsel %vm425_vm3, %v1606_v10, 0 }
 0xd1c   :  { %v1329_v20 = vpop.f32.mrb[46].mxu0 }
 0xd1d   :  { %v3177_v22 = vpop.f32.mrb[47].mxu0  ;;  %3181 = vmatmul.mubr.msk.bf16.vlgmr.msra.gmra.mrb[36].mxu1 %vm301_vm2, %v1332_v18 }
 0xd1e   :  { %3191 = vmatpush3.bf16.xpose.msra.mxu1 %v1441_v21  ;;  %3192 = vmatprep.mubr.msk.bf16.mxu1 %vm3498_vm1, %v3497_v29 }
 0xd1f   :  { %3202 = vmatprep.subr.bf16.mxu1 %v3497_v29 }
 0xd22   :  { %v1427_v23 = vpop.f32.mrb[48].mxu0 }
 0xd23   :  { %v1483_v24 = vmul.f32 0.35355338, %v1427_v23  ;;  %v3188_v25 = vpop.f32.mrb[49].mxu0 }
 0xd24   :  { %v1430_v30 = vpop.f32.mrb[50].mxu0 }
 0xd25   :  { %v3189_v32 = vpop.f32.mrb[51].mxu0  ;;  %3193 = vmatmul.mubr.msk.bf16.vlgmr.msra.gmra.mrb[40].mxu1 %vm301_vm2, %v1434_v28  ;;  %v1485_v33 = vsel %vm301_vm2, %v1483_v24, -inf }
 0xd26   :  { %1486 = vmax.xlane.f32.xlu0 %v1485_v33  ;;  %3204 = vmatprep.mubr.msk.bf16.mxu1 %vm3498_vm1, %v3497_v29 }
 0xdb3   :  { %v1487_v34 = vpop.xlane.xlu0 %1486 }
 0xdb4   :  { %v1491_v35 = vsub.f32 %v1483_v24, %v1487_v34 }
 0xdb6   :  { %v1493_v36 = vmul.f32 1.442695, %v1491_v35 }
 0xdb8   :  { %3401 = vpow2.f32 %v1493_v36 }
 0xdc2   :  { %v3402_v37 = vpop.eup %3401 }
 0xdc3   :  { %v1497_v39 = vsel %vm301_vm2, %v3402_v37, 0.0 }
 0xdc4   :  { %1498 = vadd.xlane.f32.xlu0 %v1497_v39 }
 0xdf0   :  { %v1374_v42 = vpop.f32.mrb[36].mxu1 }
 0xdf1   :  { %v3882_v43 = vadd.f32 %v1374_v42, %v3838_v40  ;;  %v3182_v45 = vpop.f32.mrb[37].mxu1 }
 0xdf2   :  { %v1377_v46 = vpop.f32.mrb[38].mxu1 }
 0xdf3   :  { %v3885_v47 = vadd.f32 %v1377_v46, %v3841_v44  ;;  %v3183_v48 = vpop.f32.mrb[39].mxu1 }
 0xdf8   :  { %v1477_v50 = vpop.f32.mrb[40].mxu1 }
 0xdf9   :  { %v1484_v52 = vmul.f32 0.35355338, %v1477_v50  ;;  %v3194_v53 = vpop.f32.mrb[41].mxu1 }
 0xdfa   :  { %v1480_v38 = vpop.f32.mrb[42].mxu1 }
 0xdfb   :  { %v3195_v41 = vpop.f32.mrb[43].mxu1  ;;  %v1488_v54 = vsel %vm301_vm2, %v1484_v52, -inf }
 0xdfc   :  { %1489 = vmax.xlane.f32.xlu1 %v1488_v54 }
 0xe0d   :  { %1557 = vrot.lane.b32.xlu1 %v3685_v26, %s3507_s20 }
 0xe11   :  { %1658 = vrot.lane.b32.xlu1 %v3680_v16, %s3508_s21 }
 0xe15   :  { %1708 = vrot.lane.b32.xlu1 %v3685_v26, %s3508_s21 }
 0xe19   :  { %1706 = vrot.lane.b32.xlu1 %v3696_v31, %s3508_s21 }
 0xe51   :  { %v1499_v61 = vpop.xlane.xlu0 %1498 }
 0xe89   :  { %v1490_v40 = vpop.xlane.xlu1 %1489 }
 0xe8a   :  { %v1492_v44 = vsub.f32 %v1484_v52, %v1490_v40 }
 0xe8c   :  { %v1495_v55 = vmul.f32 1.442695, %v1492_v44 }
 0xe8d   :  { %v1558_v57 = vpop.permute.xlu1 %1557 }
 0xe8e   :  { %3403 = vpow2.f32 %v1495_v55  ;;  %v1563_v58 = vsel %vm425_vm3, %v1558_v57, 0 }
 0xe8f   :  { %3203 = vmatpush3.bf16.msra.mxu1 %v1563_v58  ;;  %3405 = vrcp.f32 %v1499_v61 }
 0xe90   :  { %3214 = vmatprep.subr.bf16.mxu1 %v3497_v29 }
 0xe91   :  { %v1659_v6 = vpop.permute.xlu1 %1658 }
 0xe92   :  { %v1664_v8 = vsel %vm301_vm2, %v1659_v6, 0 }
 0xe95   :  { %v1709_v17 = vpop.permute.xlu1 %1708 }
 0xe96   :  { %v1714_v22 = vsel %vm301_vm2, %v1709_v17, 0 }
 0xe98   :  { %v3404_v59 = vpop.eup %3403 }
 0xe99   :  { %v1500_v60 = vsel %vm301_vm2, %v3404_v59, 0.0  ;;  %v3406_v62 = vpop.eup %3405  ;;  %v1707_v30 = vpop.permute.xlu1 %1706 }
 0xe9a   :  { %1501 = vadd.xlane.f32.xlu0 %v1500_v60  ;;  %v1505_v0 = vmul.f32 %v3406_v62, %v3402_v37 }
 0xe9c   :  { %v1507_v3 = vpack.c.bf16 %v1505_v0, %v1505_v0 }
 0xeb0   :  { %1509 = vrot.lane.b32.xlu0 %v3680_v16, %s3507_s20 }
 0xeb4   :  { %1656 = vrot.lane.b32.xlu0 %v3687_v27, %s3508_s21 }
 0xf27   :  { %v1502_v63 = vpop.xlane.xlu0 %1501 }
 0xf28   :  { %3407 = vrcp.f32 %v1502_v63 }
 0xf2b   :  { %v1510_v1 = vpop.permute.xlu0 %1509 }
 0xf2c   :  { %v1515_v2 = vsel %vm425_vm3, %v1510_v1, 0 }
 0xf2d   :  { %3197 = vmatpush3.bf16.msra.mxu0 %v1515_v2 }
 0xf2e   :  { %3208 = vmatprep.subr.bf16.mxu0 %v3497_v29 }
 0xf2f   :  { %v1657_v9 = vpop.permute.xlu0 %1656 }
 0xf30   :  { %3199 = vmatmul.mubr.msk.bf16.vlgmr.msra.gmra.mrb[52].mxu0 %vm301_vm2, %v1507_v3 }
 0xf31   :  { %3210 = vmatprep.mubr.msk.bf16.mxu0 %vm3498_vm1, %v3497_v29  ;;  %3209 = vmatpush3.bf16.msra.mxu0 %v1611_v11  ;;  %v1879_v11 = vld [vmem:[%s4164_s6 + $0x14] sm:$0xf] }
 0xf32   :  { %v3408_v4 = vpop.eup %3407  ;;  %3220 = vmatprep.subr.bf16.mxu0 %v3497_v29 }
 0xf33   :  { %v1506_v5 = vmul.f32 %v3408_v4, %v3404_v59 }
 0xf35   :  { %v1508_v7 = vpack.c.bf16 %v1506_v5, %v1506_v5 }
 0xf37   :  { %3205 = vmatmul.mubr.msk.bf16.vlgmr.msra.gmra.mrb[44].mxu1 %vm301_vm2, %v1508_v7 }
 0xf38   :  { %3215 = vmatpush3.bf16.xpose.msra.mxu1 %v1664_v8  ;;  %3216 = vmatprep.mubr.msk.bf16.mxu1 %vm3498_vm1, %v3497_v29 }
 0xf39   :  { %3226 = vmatprep.subr.bf16.mxu1 %v3497_v29 }
 0xf3f   :  { %3217 = vmatmul.mubr.msk.bf16.vlgmr.msra.gmra.mrb[48].mxu1 %vm301_vm2, %v1657_v9 }
 0xf40   :  { %3228 = vmatprep.mubr.msk.bf16.mxu1 %vm3498_vm1, %v3497_v29 }
0x1003   :  { %v1551_v12 = vpop.f32.mrb[52].mxu0 }
0x1004   :  { %v3200_v13 = vpop.f32.mrb[53].mxu0 }
0x1005   :  { %v1554_v14 = vpop.f32.mrb[54].mxu0 }
0x1006   :  { %v3201_v15 = vpop.f32.mrb[55].mxu0 }
0x100a   :  { %v1599_v18 = vpop.f32.mrb[44].mxu1 }
0x100b   :  { %v1605_v19 = vpack.c.bf16 %v1599_v18, %v1551_v12  ;;  %v3206_v20 = vpop.f32.mrb[45].mxu1  ;;  %v1884_v12 = vsel %vm425_vm3, %v1879_v11, 0 }
0x100c   :  { %v1602_v21 = vpop.f32.mrb[46].mxu1 }
0x100d   :  { %v3207_v23 = vpop.f32.mrb[47].mxu1  ;;  %3211 = vmatmul.mubr.msk.bf16.vlgmr.msra.gmra.mrb[56].mxu0 %vm301_vm2, %v1605_v19 }
0x100e   :  { %3221 = vmatpush3.bf16.xpose.msra.mxu0 %v1714_v22  ;;  %3222 = vmatprep.mubr.msk.bf16.mxu0 %vm3498_vm1, %v3497_v29 }
0x100f   :  { %3232 = vmatprep.subr.bf16.mxu0 %v3497_v29 }
0x1012   :  { %v1700_v24 = vpop.f32.mrb[48].mxu1 }
0x1013   :  { %v1756_v25 = vmul.f32 0.35355338, %v1700_v24  ;;  %v3218_v28 = vpop.f32.mrb[49].mxu1 }
0x1014   :  { %v1703_v32 = vpop.f32.mrb[50].mxu1 }
0x1015   :  { %v3219_v33 = vpop.f32.mrb[51].mxu1  ;;  %3223 = vmatmul.mubr.msk.bf16.vlgmr.msra.gmra.mrb[60].mxu0 %vm301_vm2, %v1707_v30  ;;  %v1758_v34 = vsel %vm301_vm2, %v1756_v25, -inf }
0x1016   :  { %1759 = vmax.xlane.f32.xlu0 %v1758_v34  ;;  %3234 = vmatprep.mubr.msk.bf16.mxu0 %vm3498_vm1, %v3497_v29 }
0x10a3   :  { %v1760_v35 = vpop.xlane.xlu0 %1759 }
0x10a4   :  { %v1764_v36 = vsub.f32 %v1756_v25, %v1760_v35 }
0x10a6   :  { %v1766_v37 = vmul.f32 1.442695, %v1764_v36 }
0x10a8   :  { %3409 = vpow2.f32 %v1766_v37 }
0x10b2   :  { %v3410_v39 = vpop.eup %3409 }
0x10b3   :  { %v1770_v42 = vsel %vm301_vm2, %v3410_v39, 0.0 }
0x10b4   :  { %1771 = vadd.xlane.f32.xlu0 %v1770_v42 }
0x10e0   :  { %v1647_v45 = vpop.f32.mrb[56].mxu0 }
0x10e1   :  { %v3926_v46 = vadd.f32 %v1647_v45, %v3882_v43  ;;  %v3212_v48 = vpop.f32.mrb[57].mxu0 }
0x10e2   :  { %v1650_v50 = vpop.f32.mrb[58].mxu0 }
0x10e3   :  { %v3929_v52 = vadd.f32 %v1650_v50, %v3885_v47  ;;  %v3213_v53 = vpop.f32.mrb[59].mxu0 }
0x10e8   :  { %v1750_v38 = vpop.f32.mrb[60].mxu0 }
0x10e9   :  { %v1757_v41 = vmul.f32 0.35355338, %v1750_v38  ;;  %v3224_v54 = vpop.f32.mrb[61].mxu0 }
0x10ea   :  { %v1753_v40 = vpop.f32.mrb[62].mxu0 }
0x10eb   :  { %v3225_v44 = vpop.f32.mrb[63].mxu0  ;;  %v1761_v55 = vsel %vm301_vm2, %v1757_v41, -inf }
0x10ec   :  { %1762 = vmax.xlane.f32.xlu1 %v1761_v55 }
0x10fd   :  { %1830 = vrot.lane.b32.xlu1 %v3685_v26, %s3509_s24 }
0x1101   :  { %1931 = vrot.lane.b32.xlu1 %v3680_v16, %s3510_s25 }
0x1105   :  { %1981 = vrot.lane.b32.xlu1 %v3685_v26, %s3510_s25 }
0x1109   :  { %1979 = vrot.lane.b32.xlu1 %v3696_v31, %s3510_s25 }
0x1141   :  { %v1772_v62 = vpop.xlane.xlu0 %1771 }
0x1179   :  { %v1763_v43 = vpop.xlane.xlu1 %1762 }
0x117a   :  { %v1765_v47 = vsub.f32 %v1757_v41, %v1763_v43 }
0x117c   :  { %v1768_v57 = vmul.f32 1.442695, %v1765_v47 }
0x117d   :  { %v1831_v58 = vpop.permute.xlu1 %1830 }
0x117e   :  { %3411 = vpow2.f32 %v1768_v57  ;;  %v1836_v59 = vsel %vm425_vm3, %v1831_v58, 0 }
0x117f   :  { %3233 = vmatpush3.bf16.msra.mxu0 %v1836_v59  ;;  %3413 = vrcp.f32 %v1772_v62 }
0x1180   :  { %3244 = vmatprep.subr.bf16.mxu0 %v3497_v29 }
0x1181   :  { %v1932_v7 = vpop.permute.xlu1 %1931 }
0x1182   :  { %v1937_v9 = vsel %vm301_vm2, %v1932_v7, 0 }
0x1185   :  { %v1982_v18 = vpop.permute.xlu1 %1981 }
0x1186   :  { %v1987_v23 = vsel %vm301_vm2, %v1982_v18, 0 }
0x1188   :  { %v3412_v60 = vpop.eup %3411 }
0x1189   :  { %v1773_v61 = vsel %vm301_vm2, %v3412_v60, 0.0  ;;  %v3414_v63 = vpop.eup %3413  ;;  %v1980_v32 = vpop.permute.xlu1 %1979 }
0x118a   :  { %1774 = vadd.xlane.f32.xlu0 %v1773_v61  ;;  %v1778_v1 = vmul.f32 %v3414_v63, %v3410_v39 }
0x118c   :  { %v1780_v4 = vpack.c.bf16 %v1778_v1, %v1778_v1 }
0x11a0   :  { %1782 = vrot.lane.b32.xlu0 %v3680_v16, %s3509_s24 }
0x11a4   :  { %1929 = vrot.lane.b32.xlu0 %v3687_v27, %s3510_s25 }
0x1217   :  { %v1775_v0 = vpop.xlane.xlu0 %1774 }
0x1218   :  { %3415 = vrcp.f32 %v1775_v0 }
0x121b   :  { %v1783_v2 = vpop.permute.xlu0 %1782 }
0x121c   :  { %v1788_v3 = vsel %vm425_vm3, %v1783_v2, 0 }
0x121d   :  { %3227 = vmatpush3.bf16.msra.mxu1 %v1788_v3 }
0x121e   :  { %3238 = vmatprep.subr.bf16.mxu1 %v3497_v29 }
0x121f   :  { %v1930_v10 = vpop.permute.xlu0 %1929 }
0x1220   :  { %3229 = vmatmul.mubr.msk.bf16.vlgmr.msra.gmra.mrb[52].mxu1 %vm301_vm2, %v1780_v4 }
0x1221   :  { %3240 = vmatprep.mubr.msk.bf16.mxu1 %vm3498_vm1, %v3497_v29  ;;  %3239 = vmatpush3.bf16.msra.mxu1 %v1884_v12 }
0x1222   :  { %v3416_v5 = vpop.eup %3415  ;;  %3250 = vmatprep.subr.bf16.mxu1 %v3497_v29 }
0x1223   :  { %v1779_v6 = vmul.f32 %v3416_v5, %v3412_v60 }
0x1225   :  { %v1781_v8 = vpack.c.bf16 %v1779_v6, %v1779_v6 }
0x1227   :  { %3235 = vmatmul.mubr.msk.bf16.vlgmr.msra.gmra.mrb[64].mxu0 %vm301_vm2, %v1781_v8 }
0x1228   :  { %3245 = vmatpush3.bf16.xpose.msra.mxu0 %v1937_v9  ;;  %3246 = vmatprep.mubr.msk.bf16.mxu0 %vm3498_vm1, %v3497_v29 }
0x1229   :  { %3256 = vmatprep.subr.bf16.mxu0 %v3497_v29 }
0x122f   :  { %3247 = vmatmul.mubr.msk.bf16.vlgmr.msra.gmra.mrb[68].mxu0 %vm301_vm2, %v1930_v10  ;;  %v2152_v10 = vld [vmem:[%s4164_s6 + $0x18] sm:$0xf] }
0x1230   :  { %3258 = vmatprep.mubr.msk.bf16.mxu0 %vm3498_vm1, %v3497_v29  ;;  %v2157_v11 = vsel %vm425_vm3, %v2152_v10, 0 }
0x12f3   :  { %v1824_v13 = vpop.f32.mrb[52].mxu1 }
0x12f4   :  { %v3230_v14 = vpop.f32.mrb[53].mxu1 }
0x12f5   :  { %v1827_v15 = vpop.f32.mrb[54].mxu1 }
0x12f6   :  { %v3231_v17 = vpop.f32.mrb[55].mxu1 }
0x12fa   :  { %v1872_v19 = vpop.f32.mrb[64].mxu0 }
0x12fb   :  { %v1878_v20 = vpack.c.bf16 %v1872_v19, %v1824_v13  ;;  %v3236_v21 = vpop.f32.mrb[65].mxu0 }
0x12fc   :  { %v1875_v22 = vpop.f32.mrb[66].mxu0 }
0x12fd   :  { %v3237_v24 = vpop.f32.mrb[67].mxu0  ;;  %3241 = vmatmul.mubr.msk.bf16.vlgmr.msra.gmra.mrb[56].mxu1 %vm301_vm2, %v1878_v20 }
0x12fe   :  { %3251 = vmatpush3.bf16.xpose.msra.mxu1 %v1987_v23  ;;  %3252 = vmatprep.mubr.msk.bf16.mxu1 %vm3498_vm1, %v3497_v29 }
0x12ff   :  { %3262 = vmatprep.subr.bf16.mxu1 %v3497_v29 }
0x1302   :  { %v1973_v25 = vpop.f32.mrb[68].mxu0 }
0x1303   :  { %v2029_v28 = vmul.f32 0.35355338, %v1973_v25  ;;  %v3248_v30 = vpop.f32.mrb[69].mxu0 }
0x1304   :  { %v1976_v33 = vpop.f32.mrb[70].mxu0 }
0x1305   :  { %v3249_v34 = vpop.f32.mrb[71].mxu0  ;;  %3253 = vmatmul.mubr.msk.bf16.vlgmr.msra.gmra.mrb[60].mxu1 %vm301_vm2, %v1980_v32  ;;  %v2031_v35 = vsel %vm301_vm2, %v2029_v28, -inf }
0x1306   :  { %2032 = vmax.xlane.f32.xlu0 %v2031_v35  ;;  %3264 = vmatprep.mubr.msk.bf16.mxu1 %vm3498_vm1, %v3497_v29 }
0x1393   :  { %v2033_v36 = vpop.xlane.xlu0 %2032 }
0x1394   :  { %v2037_v37 = vsub.f32 %v2029_v28, %v2033_v36 }
0x1396   :  { %v2039_v39 = vmul.f32 1.442695, %v2037_v37 }
0x1398   :  { %3417 = vpow2.f32 %v2039_v39 }
0x13a2   :  { %v3418_v42 = vpop.eup %3417 }
0x13a3   :  { %v2043_v45 = vsel %vm301_vm2, %v3418_v42, 0.0 }
0x13a4   :  { %2044 = vadd.xlane.f32.xlu0 %v2043_v45 }
0x13d0   :  { %v1920_v48 = vpop.f32.mrb[56].mxu1 }
0x13d1   :  { %v3970_v50 = vadd.f32 %v1920_v48, %v3926_v46  ;;  %v3242_v53 = vpop.f32.mrb[57].mxu1 }
0x13d2   :  { %v1923_v38 = vpop.f32.mrb[58].mxu1 }
0x13d3   :  { %v3973_v41 = vadd.f32 %v1923_v38, %v3929_v52  ;;  %v3243_v54 = vpop.f32.mrb[59].mxu1 }
0x13d8   :  { %v2023_v40 = vpop.f32.mrb[60].mxu1 }
0x13d9   :  { %v2030_v44 = vmul.f32 0.35355338, %v2023_v40  ;;  %v3254_v55 = vpop.f32.mrb[61].mxu1 }
0x13da   :  { %v2026_v43 = vpop.f32.mrb[62].mxu1 }
0x13db   :  { %v3255_v47 = vpop.f32.mrb[63].mxu1  ;;  %v2034_v57 = vsel %vm301_vm2, %v2030_v44, -inf }
0x13dc   :  { %2035 = vmax.xlane.f32.xlu1 %v2034_v57 }
0x13ed   :  { %2103 = vrot.lane.b32.xlu1 %v3685_v26, %s3511_s4 }
0x13f1   :  { %2204 = vrot.lane.b32.xlu1 %v3680_v16, %s3512_s5 }
0x13f5   :  { %2254 = vrot.lane.b32.xlu1 %v3685_v26, %s3512_s5 }
0x13f9   :  { %2252 = vrot.lane.b32.xlu1 %v3696_v31, %s3512_s5 }
0x1431   :  { %v2045_v63 = vpop.xlane.xlu0 %2044 }
0x1469   :  { %v2036_v46 = vpop.xlane.xlu1 %2035 }
0x146a   :  { %v2038_v52 = vsub.f32 %v2030_v44, %v2036_v46 }
0x146c   :  { %v2041_v58 = vmul.f32 1.442695, %v2038_v52 }
0x146d   :  { %v2104_v59 = vpop.permute.xlu1 %2103 }
0x146e   :  { %3419 = vpow2.f32 %v2041_v58  ;;  %v2109_v60 = vsel %vm425_vm3, %v2104_v59, 0 }
0x146f   :  { %3263 = vmatpush3.bf16.msra.mxu1 %v2109_v60  ;;  %3421 = vrcp.f32 %v2045_v63 }
0x1470   :  { %3274 = vmatprep.subr.bf16.mxu1 %v3497_v29 }
0x1471   :  { %v2205_v6 = vpop.permute.xlu1 %2204 }
0x1472   :  { %v2210_v8 = vsel %vm301_vm2, %v2205_v6, 0 }
0x1475   :  { %v2255_v17 = vpop.permute.xlu1 %2254 }
0x1476   :  { %v2260_v22 = vsel %vm301_vm2, %v2255_v17, 0 }
0x1478   :  { %v3420_v61 = vpop.eup %3419 }
0x1479   :  { %v2046_v62 = vsel %vm301_vm2, %v3420_v61, 0.0  ;;  %v3422_v31 = vpop.eup %3421  ;;  %v2253_v30 = vpop.permute.xlu1 %2252 }
0x147a   :  { %2047 = vadd.xlane.f32.xlu0 %v2046_v62  ;;  %v2051_v1 = vmul.f32 %v3422_v31, %v3418_v42 }
0x147c   :  { %v2053_v4 = vpack.c.bf16 %v2051_v1, %v2051_v1 }
0x1490   :  { %2055 = vrot.lane.b32.xlu0 %v3680_v16, %s3511_s4 }
0x1494   :  { %2202 = vrot.lane.b32.xlu0 %v3687_v27, %s3512_s5 }
0x1507   :  { %v2048_v0 = vpop.xlane.xlu0 %2047 }
0x1508   :  { %3423 = vrcp.f32 %v2048_v0 }
0x150b   :  { %v2056_v2 = vpop.permute.xlu0 %2055 }
0x150c   :  { %v2061_v3 = vsel %vm425_vm3, %v2056_v2, 0 }
0x150d   :  { %3257 = vmatpush3.bf16.msra.mxu0 %v2061_v3 }
0x150e   :  { %3268 = vmatprep.subr.bf16.mxu0 %v3497_v29 }
0x150f   :  { %v2203_v9 = vpop.permute.xlu0 %2202 }
0x1510   :  { %3259 = vmatmul.mubr.msk.bf16.vlgmr.msra.gmra.mrb[72].mxu0 %vm301_vm2, %v2053_v4 }
0x1511   :  { %3270 = vmatprep.mubr.msk.bf16.mxu0 %vm3498_vm1, %v3497_v29  ;;  %3269 = vmatpush3.bf16.msra.mxu0 %v2157_v11 }
0x1512   :  { %v3424_v5 = vpop.eup %3423  ;;  %3280 = vmatprep.subr.bf16.mxu0 %v3497_v29 }
0x1513   :  { %v2052_v27 = vmul.f32 %v3424_v5, %v3420_v61  ;;  %v2425_v5 = vld [vmem:[%s4164_s6 + $0x1c] sm:$0xf] }
0x1515   :  { %v2054_v7 = vpack.c.bf16 %v2052_v27, %v2052_v27  ;;  %v2430_v27 = vsel %vm425_vm3, %v2425_v5, 0 }
0x1517   :  { %3265 = vmatmul.mubr.msk.bf16.vlgmr.msra.gmra.mrb[64].mxu1 %vm301_vm2, %v2054_v7 }
0x1518   :  { %3275 = vmatpush3.bf16.xpose.msra.mxu1 %v2210_v8  ;;  %3276 = vmatprep.mubr.msk.bf16.mxu1 %vm3498_vm1, %v3497_v29 }
0x1519   :  { %3286 = vmatprep.subr.bf16.mxu1 %v3497_v29 }
0x151f   :  { %3277 = vmatmul.mubr.msk.bf16.vlgmr.msra.gmra.mrb[68].mxu1 %vm301_vm2, %v2203_v9 }
0x1520   :  { %3288 = vmatprep.mubr.msk.bf16.mxu1 %vm3498_vm1, %v3497_v29 }
0x15e3   :  { %v2097_v12 = vpop.f32.mrb[72].mxu0 }
0x15e4   :  { %v3260_v13 = vpop.f32.mrb[73].mxu0 }
0x15e5   :  { %v2100_v14 = vpop.f32.mrb[74].mxu0 }
0x15e6   :  { %v3261_v15 = vpop.f32.mrb[75].mxu0  ;;  %v2477_v14 = vsub.s32 3, %v3658_v49 }
0x15e7   :  { %v4034_v15 = vld [vmem:[#allocation2] sm:$0xff] }
0x15e8   :  { %v2478_v17 = vrot.slane %v4034_v15, %v2477_v14  ;;  %v3351_v14 = vld [vmem:[%s4167_s9 + $0x58] sm:$0xff]  }
0x15ea   :  { %v2145_v18 = vpop.f32.mrb[64].mxu1 }
0x15eb   :  { %v2151_v19 = vpack.c.bf16 %v2145_v18, %v2097_v12  ;;  %v3266_v20 = vpop.f32.mrb[65].mxu1 }
0x15ec   :  { %v2148_v21 = vpop.f32.mrb[66].mxu1 }
0x15ed   :  { %v3267_v23 = vpop.f32.mrb[67].mxu1  ;;  %3271 = vmatmul.mubr.msk.bf16.vlgmr.msra.gmra.mrb[76].mxu0 %vm301_vm2, %v2151_v19 }
0x15ee   :  { %3281 = vmatpush3.bf16.xpose.msra.mxu0 %v2260_v22  ;;  %3282 = vmatprep.mubr.msk.bf16.mxu0 %vm3498_vm1, %v3497_v29 }
0x15ef   :  { %3292 = vmatprep.subr.bf16.mxu0 %v3497_v29 }
0x15f2   :  { %v2246_v24 = vpop.f32.mrb[68].mxu1 }
0x15f3   :  { %v2302_v25 = vmul.f32 0.35355338, %v2246_v24  ;;  %v3278_v28 = vpop.f32.mrb[69].mxu1 }
0x15f4   :  { %v2249_v32 = vpop.f32.mrb[70].mxu1 }
0x15f5   :  { %v3279_v33 = vpop.f32.mrb[71].mxu1  ;;  %3283 = vmatmul.mubr.msk.bf16.vlgmr.msra.gmra.mrb[80].mxu0 %vm301_vm2, %v2253_v30  ;;  %v2304_v34 = vsel %vm301_vm2, %v2302_v25, -inf  ;;  %v3447_v32 = vld [vmem:[%s4158_s0 + $0x8] sm:$0xff] }
0x15f6   :  { %2305 = vmax.xlane.f32.xlu0 %v2304_v34  ;;  %3294 = vmatprep.mubr.msk.bf16.mxu0 %vm3498_vm1, %v3497_v29 }
0x1683   :  { %v2306_v35 = vpop.xlane.xlu0 %2305 }
0x1684   :  { %v2310_v36 = vsub.f32 %v2302_v25, %v2306_v35  ;;  %v3446_v25 = vld [vmem:[%s4158_s0] sm:$0xff] }
0x1686   :  { %v2312_v37 = vmul.f32 1.442695, %v2310_v36 }
0x1688   :  { %3425 = vpow2.f32 %v2312_v37 }
0x1692   :  { %v3426_v39 = vpop.eup %3425 }
0x1693   :  { %v2316_v42 = vsel %vm301_vm2, %v3426_v39, 0.0 }
0x1694   :  { %2317 = vadd.xlane.f32.xlu0 %v2316_v42 }
0x16c0   :  { %v2193_v45 = vpop.f32.mrb[76].mxu0 }
0x16c1   :  { %v2200_v48 = vadd.f32 %v2193_v45, %v3970_v50  ;;  %v3272_v53 = vpop.f32.mrb[77].mxu0 }
0x16c2   :  { %v2196_v38 = vpop.f32.mrb[78].mxu0 }
0x16c3   :  { %v2201_v54 = vadd.f32 %v2196_v38, %v3973_v41  ;;  %v3273_v40 = vpop.f32.mrb[79].mxu0 }
0x16c8   :  { %v2296_v44 = vpop.f32.mrb[80].mxu0 }
0x16c9   :  { %v2303_v55 = vmul.f32 0.35355338, %v2296_v44  ;;  %v3284_v43 = vpop.f32.mrb[81].mxu0  ;;  %v3335_v44 = vld [vmem:[%s4165_s7 + $0x4] ss:$8 sps:$4 sm:$0xff]  }
0x16ca   :  { %v2299_v47 = vpop.f32.mrb[82].mxu0  ;;  %v3338_v43 = vld [vmem:[%s4165_s7 + $0x14] ss:$8 sps:$4 sm:$0xff]  }
0x16cb   :  { %v3285_v57 = vpop.f32.mrb[83].mxu0  ;;  %v2307_v46 = vsel %vm301_vm2, %v2303_v55, -inf  ;;  %v3336_v47 = vld [vmem:[%s4165_s7 + $0x10] ss:$8 sps:$4 sm:$0xff]  }
0x16cc   :  { %2308 = vmax.xlane.f32.xlu1 %v2307_v46  ;;  %v3341_v57 = vld [vmem:[%s4165_s7 + $0x24] ss:$8 sps:$4 sm:$0xff]   ;;  %v3339_v46 = vld [vmem:[%s4165_s7 + $0x20] ss:$8 sps:$4 sm:$0xff]  }
0x16dd   :  { %2376 = vrot.lane.b32.xlu1 %v3685_v26, %s3513_s29 }
0x1721   :  { %v2318_v62 = vpop.xlane.xlu0 %2317 }
0x1759   :  { %v2309_v52 = vpop.xlane.xlu1 %2308 }
0x175a   :  { %v2311_v58 = vsub.f32 %v2303_v55, %v2309_v52  ;;  %v3333_v55 = vld [vmem:[%s4165_s7] ss:$8 sps:$4 sm:$0xff]   ;;  %v3344_v52 = vld [vmem:[%s4165_s7 + $0x34] ss:$8 sps:$4 sm:$0xff]  }
0x175c   :  { %v2314_v50 = vmul.f32 1.442695, %v2311_v58  ;;  %v3342_v58 = vld [vmem:[%s4165_s7 + $0x30] ss:$8 sps:$4 sm:$0xff]  }
0x175d   :  { %v2377_v59 = vpop.permute.xlu1 %2376 }
0x175e   :  { %3427 = vpow2.f32 %v2314_v50  ;;  %v2382_v41 = vsel %vm425_vm3, %v2377_v59, 0  ;;  %v3514_v50 = vmov 0   ;;  %v3345_v59 = vld [vmem:[%s4167_s9 + $0x40] sm:$0xff]  }
0x175f   :  { %3293 = vmatpush3.bf16.msra.mxu0 %v2382_v41  ;;  %3429 = vrcp.f32 %v2318_v62  ;;  %v3346_v41 = vld [vmem:[%s4167_s9] sm:$0xff]  }
0x1760   :  { %2585 = vmatprep.subr.bf16.mxu0 %v3335_v44 }
0x1768   :  { %v3428_v60 = vpop.eup %3427 }
0x1769   :  { %v2319_v61 = vsel %vm301_vm2, %v3428_v60, 0.0  ;;  %v3430_v63 = vpop.eup %3429 }
0x176a   :  { %2320 = vadd.xlane.f32.xlu0 %v2319_v61  ;;  %v2324_v26 = vmul.f32 %v3430_v63, %v3426_v39  ;;  %v3348_v61 = vld [vmem:[%s4167_s9 + $0x8] sm:$0xff]  }
0x176c   :  { %v2326_v2 = vpack.c.bf16 %v2324_v26, %v2324_v26 }
0x1780   :  { %2328 = vrot.lane.b32.xlu0 %v3680_v16, %s3513_s29 }
0x17f7   :  { %v2321_v31 = vpop.xlane.xlu0 %2320 }
0x17f8   :  { %3431 = vrcp.f32 %v2321_v31 }
0x17fb   :  { %v2329_v0 = vpop.permute.xlu0 %2328 }
0x17fc   :  { %v2334_v1 = vsel %vm425_vm3, %v2329_v0, 0 }
0x17fd   :  { %3287 = vmatpush3.bf16.msra.mxu1 %v2334_v1 }
0x17fe   :  { %3298 = vmatprep.subr.bf16.mxu1 %v3497_v29 }
0x1800   :  { %3289 = vmatmul.mubr.msk.bf16.vlgmr.msra.gmra.mrb[72].mxu1 %vm301_vm2, %v2326_v2  ;;  %v2511_v2 = vsub.s32 4, %v3658_v49 }
0x1801   :  { %3300 = vmatprep.mubr.msk.bf16.mxu1 %vm3498_vm1, %v3497_v29  ;;  %3299 = vmatpush3.bf16.msra.mxu1 %v2430_v27 }
0x1802   :  { %v3432_v3 = vpop.eup %3431  ;;  %3018 = vmatprep.subr.bf16.mxu1 %v3345_v59 }
0x1803   :  { %v2325_v16 = vmul.f32 %v3432_v3, %v3428_v60  ;;  %v3347_v60 = vld [vmem:[%s4167_s9 + $0x48] sm:$0xff]   ;;  %v2512_v3 = vrot.slane %v4034_v15, %v2511_v2 }
0x1805   :  { %v2327_v4 = vpack.c.bf16 %v2325_v16, %v2325_v16  ;;  %v2517_v16 = vsub.s32 5, %v3658_v49 }
0x1807   :  { %3295 = vmatmul.mubr.msk.bf16.vlgmr.msra.gmra.mrb[84].mxu0 %vm301_vm2, %v2327_v4 }
0x1808   :  { %2586 = vmatpush1.bf16.msra.mxu0 %v3333_v55  ;;  %2617 = vmatprep.mubr.bf16.mxu0 %v3514_v50 }
0x1809   :  { %2587 = vmatprep.subr.bf16.mxu0 %v3338_v43 }
0x180c   :  { %2588 = vmatpush1.bf16.msra.mxu0 %v3336_v47 }
0x180d   :  { %2589 = vmatprep.subr.bf16.mxu0 %v3341_v57 }
0x1810   :  { %2590 = vmatpush1.bf16.msra.mxu0 %v3339_v46 }
0x1811   :  { %2591 = vmatprep.subr.bf16.mxu0 %v3344_v52 }
0x1814   :  { %2592 = vmatpush1.bf16.msra.mxu0 %v3342_v58 }
0x18d3   :  { %v2370_v6 = vpop.f32.mrb[72].mxu1 }
0x18d4   :  { %v3290_v7 = vpop.f32.mrb[73].mxu1 }
0x18d5   :  { %v2373_v8 = vpop.f32.mrb[74].mxu1 }
0x18d6   :  { %v3291_v9 = vpop.f32.mrb[75].mxu1  ;;  %v2518_v8 = vrot.slane %v4034_v15, %v2517_v16 }
0x18da   :  { %v2418_v10 = vpop.f32.mrb[84].mxu0 }
0x18db   :  { %v2424_v11 = vpack.c.bf16 %v2418_v10, %v2370_v6  ;;  %v3296_v12 = vpop.f32.mrb[85].mxu0 }
0x18dc   :  { %v2421_v29 = vpop.f32.mrb[86].mxu0 }
0x18dd   :  { %v3297_v13 = vpop.f32.mrb[87].mxu0  ;;  %3301 = vmatmul.mubr.msk.bf16.vlgmr.msra.gmra.mrb[76].mxu1 %vm301_vm2, %v2424_v11  ;;  %v3349_v29 = vld [vmem:[%s4167_s9 + $0x50] sm:$0xff]  }
0x18de   :  { %3019 = vmatpush3.bf16.msra.mxu1 %v3346_v41  ;;  %v3350_v13 = vld [vmem:[%s4167_s9 + $0x10] sm:$0xff]  }
0x18df   :  { %3020 = vmatprep.subr.bf16.mxu1 %v3347_v60 }
0x18e2   :  { %3021 = vmatpush3.bf16.msra.mxu1 %v3348_v61 }
0x18e3   :  { %3022 = vmatprep.subr.bf16.mxu1 %v3349_v29 }
0x18e6   :  { %3023 = vmatpush3.bf16.msra.mxu1 %v3350_v13 }
0x18e7   :  { %3024 = vmatprep.subr.bf16.mxu1 %v3351_v14 }
0x19b0   :  { %v2466_v18 = vpop.f32.mrb[76].mxu1 }
0x19b1   :  { %v2473_v19 = vadd.f32 %v2466_v18, %v2200_v48  ;;  %v3302_v20 = vpop.f32.mrb[77].mxu1  ;;  %v3353_v18 = vld [vmem:[%s4167_s9 + $0x60] sm:$0xff]  }
0x19b2   :  { %v2469_v21 = vpop.f32.mrb[78].mxu1  ;;  %v3355_v20 = vld [vmem:[%s4167_s9 + $0x68] sm:$0xff]  }
0x19b3   :  { %v2479_v22 = vadd.f32 %v2478_v17, %v2473_v19  ;;  %v2474_v23 = vadd.f32 %v2469_v21, %v2201_v54  ;;  %v3303_v24 = vpop.f32.mrb[79].mxu1  ;;  %v3354_v19 = vld [vmem:[%s4167_s9 + $0x20] sm:$0xff]   ;;  %v3356_v21 = vld [vmem:[%s4167_s9 + $0x28] sm:$0xff]  }
0x19b4   :  { %v3359_v24 = vld [vmem:[%s4167_s9 + $0x78] sm:$0xff]  }
0x19b5   :  { %v4040_v28 = vadd.f32 %v3446_v25, %v2479_v22  ;;  %v2480_v30 = vadd.f32 %v2478_v17, %v2474_v23  ;;  %v3352_v17 = vld [vmem:[%s4167_s9 + $0x18] sm:$0xff]   ;;  %v3357_v22 = vld [vmem:[%s4167_s9 + $0x70] sm:$0xff]  }
0x19b6   :  { %3025 = vmatpush3.bf16.msra.mxu1 %v3352_v17  ;;  %v3358_v23 = vld [vmem:[%s4167_s9 + $0x30] sm:$0xff]   ;;  %v3360_v25 = vld [vmem:[%s4167_s9 + $0x38] sm:$0xff]  }
0x19b7   :  { %v4045_v33 = vadd.f32 %v3447_v32, %v2480_v30  ;;  %v2483_v34 = vsel %vm54_vm0, %v4040_v28, 0.0  ;;  %3026 = vmatprep.subr.bf16.mxu1 %v3353_v18  ;;  %v2530_v30 = vld [vmem:[%s4166_s8] sm:$0x3]  ;;  %s3515_s8 = smov [#allocation5]  }
0x19b8   :  { %2484 = vadd.xlane.f32.xlu1 %v2483_v34  ;;  %v2535_v32 = vrot.slane %v2530_v30, %v84_v51  ;;  %v2539_v34 = vrot.slane %v2530_v30, %v90_v56  ;;  %s2832_s9 = sshll.u32 %s3515_s8, 4  ;;  %s2833_s9 = int_to_ptr.vmem [resolvable:$true] %s2832_s9 }
0x19b9   :  { %v2486_v35 = vsel %vm54_vm0, %v4045_v33, 0.0  ;;  %s3470_s7 = scalar_lea.vmem %s2833_s9, 256  ;;  %p3475_p9 = scmp.lt.s32.totalorder %s2833_s9, %s2833_s9 }
0x19ba   :  { %2487 = vadd.xlane.f32.xlu0 %v2486_v35  ;;  %3027 = vmatpush3.bf16.msra.mxu1 %v3354_v19  ;;  %p3471_p8 = scmp.ne.s32.totalorder %s2833_s9, %s3470_s7  ;;  %p3476_p10 = scmp.lt.s32.totalorder %s3470_s7, %s3470_s7 }
0x19bb   :  { %3028 = vmatprep.subr.bf16.mxu1 %v3355_v20 }
0x19bc   :  { %p3477_p11 = por %p3476_p10, %p3475_p9 }
0x19be   :  { %3029 = vmatpush3.bf16.msra.mxu1 %v3356_v21  ;;  %p3478_p12 = pnand %p3477_p11, %p3471_p8 }
0x19bf   :  { %3030 = vmatprep.subr.bf16.mxu1 %v3357_v22 }
0x19c2   :  { %3031 = vmatpush3.bf16.msra.mxu1 %v3358_v23 }
0x19c3   :  { %3032 = vmatprep.subr.bf16.mxu1 %v3359_v24 }
0x19c6   :  { %3033 = vmatpush3.bf16.msra.mxu1 %v3360_v25 }
0x1a45   :  { %v2485_v36 = vpop.xlane.xlu1 %2484 }
0x1a46   :  { %v2489_v37 = vmul.f32 0.015625, %v2485_v36 }
0x1a47   :  { %v2488_v39 = vpop.xlane.xlu0 %2487 }
0x1a48   :  { %v2491_v42 = vsub.f32 %v4040_v28, %v2489_v37  ;;  %v2490_v45 = vmul.f32 0.015625, %v2488_v39 }
0x1a4a   :  { %v2492_v48 = vsub.f32 %v4045_v33, %v2490_v45  ;;  %v2493_v53 = vmul.f32 %v2491_v42, %v2491_v42 }
0x1a4c   :  { %v2495_v38 = vsel %vm54_vm0, %v2493_v53, 0.0  ;;  %v2494_v54 = vmul.f32 %v2492_v48, %v2492_v48 }
0x1a4d   :  { %2496 = vadd.xlane.f32.xlu0 %v2495_v38 }
0x1a4e   :  { %v2498_v40 = vsel %vm54_vm0, %v2494_v54, 0.0 }
0x1a4f   :  { %2499 = vadd.xlane.f32.xlu1 %v2498_v40 }
0x1ada   :  { %v2497_v62 = vpop.xlane.xlu0 %2496 }
0x1adb   :  { %v2501_v63 = vmul.f32 0.015625, %v2497_v62 }
0x1adc   :  { %v2500_v31 = vpop.xlane.xlu1 %2499 }
0x1add   :  { %v2503_v26 = vadd.f32 1e-05, %v2501_v63  ;;  %v2502_v0 = vmul.f32 0.015625, %v2500_v31 }
0x1adf   :  { %3433 = vrsqrt.f32 %v2503_v26  ;;  %v2504_v1 = vadd.f32 1e-05, %v2502_v0  ;;  %v2684_v0 = vsub.s32 6, %v3658_v49 }
0x1ae1   :  { %3435 = vrsqrt.f32 %v2504_v1  ;;  %v2685_v2 = vrot.slane %v4034_v15, %v2684_v0 }
0x1ae9   :  { %v3434_v4 = vpop.eup %3433 }
0x1aea   :  { %v2507_v5 = vmul.f32 %v3434_v4, %v2491_v42 }
0x1aeb   :  { %v3436_v27 = vpop.eup %3435 }
0x1aec   :  { %v2513_v6 = vmul.f32 %v2512_v3, %v2507_v5  ;;  %v2508_v7 = vmul.f32 %v3436_v27, %v2492_v48 }
0x1aee   :  { %v2514_v9 = vmul.f32 %v2512_v3, %v2508_v7  ;;  %v2519_v10 = vadd.f32 %v2518_v8, %v2513_v6 }
0x1af0   :  { %v2520_v11 = vadd.f32 %v2518_v8, %v2514_v9 }
0x1af2   :  { %v2521_v12 = vpack.c.bf16 %v2520_v11, %v2519_v10 }
0x1af4   :  { %2907 = vmatmul.mubr.msk.bf16.vlgmr.msra.gmra.mrb[88].mxu0 %vm54_vm0, %v2521_v12 }
0x1bc7   :  { %v2619_v35 = vpop.f32.mrb[88].mxu0 }
0x1bc8   :  { %v2620_v36 = vadd.f32 %v2619_v35, %v2535_v32  ;;  %v2621_v37 = vpop.f32.mrb[89].mxu0 }
0x1bc9   :  { %v2622_v39 = vadd.f32 %v2621_v37, %v2539_v34  ;;  %v2623_v42 = vpop.f32.mrb[90].mxu0 }
0x1bca   :  { %v2632_v45 = vmul.f32 0.70710677, %v2620_v36  ;;  %v2624_v48 = vadd.f32 %v2623_v42, %v2535_v32  ;;  %v2625_v53 = vpop.f32.mrb[91].mxu0  ;;  %v2628_v46 = vmul.f32 0.5, %v2620_v36 }
0x1bcb   :  { %v2633_v38 = vmul.f32 0.70710677, %v2622_v39  ;;  %v2626_v54 = vadd.f32 %v2625_v53, %v2539_v34  ;;  %v2629_v50 = vmul.f32 0.5, %v2622_v39 }
0x1bcc   :  { %3437 = verf.f32 %v2632_v45  ;;  %v2634_v40 = vmul.f32 0.70710677, %v2624_v48  ;;  %v2630_v52 = vmul.f32 0.5, %v2624_v48 }
0x1bcd   :  { %3439 = verf.f32 %v2633_v38  ;;  %v2635_v44 = vmul.f32 0.70710677, %v2626_v54  ;;  %v2631_v59 = vmul.f32 0.5, %v2626_v54 }
0x1bce   :  { %3441 = verf.f32 %v2634_v40 }
0x1bcf   :  { %3443 = verf.f32 %v2635_v44 }
0x1bd6   :  { %v3438_v51 = vpop.eup %3437 }
0x1bd7   :  { %v3440_v55 = vpop.eup %3439  ;;  %v2640_v43 = vadd.f32 1.0, %v3438_v51 }
0x1bd8   :  { %v3442_v56 = vpop.eup %3441  ;;  %v2641_v47 = vadd.f32 1.0, %v3440_v55 }
0x1bd9   :  { %v3444_v57 = vpop.eup %3443  ;;  %v2642_v58 = vadd.f32 1.0, %v3442_v56  ;;  %v2644_v60 = vmul.f32 %v2640_v43, %v2628_v46 }
0x1bda   :  { %v2643_v41 = vadd.f32 1.0, %v3444_v57  ;;  %v2645_v62 = vmul.f32 %v2641_v47, %v2629_v50 }
0x1bdb   :  { %v2646_v61 = vmul.f32 %v2642_v58, %v2630_v52 }
0x1bdc   :  { %v2647_v63 = vmul.f32 %v2643_v41, %v2631_v59 }
0x1bdd   :  { %v2648_v31 = vpack.c.bf16 %v2646_v61, %v2644_v60 }
0x1bde   :  { %v2649_v26 = vpack.c.bf16 %v2647_v63, %v2645_v62 }
0x1be0   :  { %2814 = vmatprep.mubr.bf16.mxu1 %v2649_v26 }
0x1be1   :  { %2815 = vmatmul.mubr.bf16.vlgmr.msra.gmra.mrb[80].mxu1 %v2648_v31 }
0x1cb4   :  { %v3034_v1 = vpop.f32.mrb[80].mxu1 }
0x1cb5   :  { %v3035_v3 = vpop.f32.mrb[81].mxu1 }
0x1cb6   :  { %v3036_v16 = vadd.f32 %v3035_v3, %v3034_v1  ;;  %v3037_v4 = vpop.f32.mrb[82].mxu1 }
0x1cb7   :  { %v3038_v5 = vpop.f32.mrb[83].mxu1 }
0x1cb8   :  { %v2817_v27 = vadd.f32 %v3036_v16, %v2685_v2  ;;  %v3039_v6 = vadd.f32 %v3038_v5, %v3037_v4 }
0x1cba   :  { %v2823_v7 = vadd.f32 %v2817_v27, %v4040_v28  ;;  %v2820_v8 = vadd.f32 %v3039_v6, %v2685_v2 }
0x1cbc   :  { %2825 = vst.msk [vmem:[#allocation5] sm:$0xff] %vm54_vm0, %v2823_v7  ;;  %v2824_v9 = vadd.f32 %v2820_v8, %v4045_v33 }
0x1cbe   :  { %2826 = vst.msk [vmem:[#allocation5 + $0x8] sm:$0xff] %vm54_vm0, %v2824_v9 }
0x1cbf   :  { %3481 = shalt.err (!%p3478_p12)
}
0x1cc0   :  { %s3482_s12 = scalar_lea.hbm %s4168_s10, 256 }
0x1cc1   :  { %p3483_p13 = scmp.ne.s32.totalorder %s4168_s10, %s3482_s12  ;;  %p3486_p0 = scmp.lt.u32.totalorder %s3482_s12, %s4168_s10 }
0x1cc3   :  { %p3488_p1 = pnand %p3486_p0, %p3483_p13 }
0x1cc5   :  { %3491 = shalt.err (!%p3488_p1)
}
0x1cc6   :  { %s3516_s16 = smov 128  }
0x1cc7   :  { %2838 = dma.vmem_to_hbm [thread:$0]  %s2833_s9, 256, %s4168_s10, [#allocation4], %s3516_s16, %s3516_s16, %s3513_s29  }
0x1cc8   :  { %3494 = dma.done.wait [#allocation4], 256  }
0x1cc9   :  { %3495 = vsyncadd [#allocation4], 4294967040 }
0x1cca   :  { %2842 = vsyncpa [#allocation3], 1 }
0x1ccb   :  { %2843 = vsyncpa [#allocation4], 1 }

</bundles_post_ra>
